<compile_context>
chip_gen: v7x
topology: tpu7x:2x2x1
jax: 0.10.0
libtpu: 0.0.40
codegen_flags: <defaults>
</compile_context>

<pallas_src>
import jax
import jax.numpy as jnp
from jax.experimental import pallas as pl
from jax.experimental.pallas import tpu as pltpu


def _round_up(n, m):
    return ((n + m - 1) // m) * m


def _emlp_kernel(x_ref,
                 w1_ref, b1_ref,
                 w2_ref, b2_ref,
                 w3_ref, b3_ref,
                 w4_ref, b4_ref,
                 w5_ref, b5_ref,
                 out_ref):
    """One batch tile: 4x (bf16 MXU matmul -> f32 acc + bias + ReLU) + lane-reduction + sigmoid."""
    bf16 = jnp.bfloat16
    # Layer 1: bf16 inputs on the MXU, f32 accumulation; bias + ReLU in f32 on the VPU.
    h_f32 = jnp.maximum(
        jnp.dot(x_ref[...].astype(bf16), w1_ref[...],
                preferred_element_type=jnp.float32) + b1_ref[...], 0.0)
    # Layers 2-4: cast the f32 ReLU output back to bf16 only at the MXU input.
    h_f32 = jnp.maximum(
        jnp.dot(h_f32.astype(bf16), w2_ref[...],
                preferred_element_type=jnp.float32) + b2_ref[...], 0.0)
    h_f32 = jnp.maximum(
        jnp.dot(h_f32.astype(bf16), w3_ref[...],
                preferred_element_type=jnp.float32) + b3_ref[...], 0.0)
    h_f32 = jnp.maximum(
        jnp.dot(h_f32.astype(bf16), w4_ref[...],
                preferred_element_type=jnp.float32) + b4_ref[...], 0.0)
    # Final layer has out_features == 1: a K x 1 MXU matmul still pays a full systolic
    # push/pop on the serial dependency chain; do it as an f32 lane reduction instead.
    # w5_ref is stored as an f32 (1, hidden_padded) row vector.
    logits = jnp.sum(h_f32 * w5_ref[...], axis=-1, keepdims=True) + b5_ref[...]
    out_ref[...] = jax.nn.sigmoid(logits)   # exp on EUP; no explicit f32 divide


def emlp_forward(x, padded_params, *, tb=1024):
    """x: (B, D) f32. padded_params: dict of lane-padded weights/biases. Returns (B, 1) f32."""
    B, D = x.shape
    # Batch tile must satisfy the sublane rule -> multiple of 8; clamp to padded batch.
    b_pad8 = _round_up(B, 8)
    tb = _round_up(max(8, min(tb, b_pad8)), 8)
    # v7x has 2 TensorCores: keep at least 2 batch tiles whenever the batch allows it so
    # dimension_semantics=("parallel",) can shard tiles across both (no-op on v5e/v6e).
    if b_pad8 >= 16:
        tb = min(tb, _round_up(b_pad8 // 2, 8))
    b_pad = _round_up(b_pad8, tb)
    if b_pad != B:
        x = jnp.pad(x, ((0, b_pad - B), (0, 0)))

    p = padded_params
    weight_args = (p["w1"], p["b1"], p["w2"], p["b2"], p["w3"], p["b3"],
                   p["w4"], p["b4"], p["w5"], p["b5"])

    def resident(a):
        # Full-shape block + constant index_map: DMA'd to VMEM once, resident across all
        # batch-grid steps (no per-step weight DMA).  Buffered(1): the block index never
        # changes, so double-buffering the resident weight set only wastes VMEM — matters
        # most under v5e's default scoped limit and v7x's 64 MiB physical VMEM.
        return pl.BlockSpec(a.shape, lambda i: (0, 0), pipeline_mode=pl.Buffered(1))

    grid = (b_pad // tb,)
    out = pl.pallas_call(
        _emlp_kernel,
        out_shape=jax.ShapeDtypeStruct((b_pad, 1), jnp.float32),
        grid=grid,
        in_specs=[pl.BlockSpec((tb, D), lambda i: (i, 0))] +
                 [resident(a) for a in weight_args],
        out_specs=pl.BlockSpec((tb, 1), lambda i: (i, 0)),
        compiler_params=pltpu.CompilerParams(
            dimension_semantics=("parallel",),      # shards batch tiles across TCs on v7x
            vmem_limit_bytes=32 * 1024 * 1024,      # safe headroom for tb up to ~2048
        ),
    )(x, *weight_args)
    return out[:B]


def init_params(key, input_dimension):
    """Deterministic init mimicking PyTorch nn.Linear default (uniform +-1/sqrt(fan_in)).
    Weights stored as (in_features, out_features); biases as (1, out_features)."""
    hidden_units = int(max(30, round(input_dimension / 30)) * 10)
    out_units = 1
    dims = [(input_dimension, hidden_units),
            (hidden_units, hidden_units),
            (hidden_units, hidden_units),
            (hidden_units, hidden_units),
            (hidden_units, out_units)]
    params = {}
    for i, (fan_in, fan_out) in enumerate(dims, start=1):
        key, kw, kb = jax.random.split(key, 3)
        bound = 1.0 / (fan_in ** 0.5)
        params[f"w{i}"] = jax.random.uniform(
            kw, (fan_in, fan_out), jnp.float32, minval=-bound, maxval=bound)
        params[f"b{i}"] = jax.random.uniform(
            kb, (1, fan_out), jnp.float32, minval=-bound, maxval=bound)
    return params, hidden_units


def pad_params(params, hidden_units):
    """Zero-pad the hidden dimension to a multiple of 128 lanes (300 -> 384; no further
    padding — 384 = 3x128 is already MXU-shaped on all generations).  Padded units get
    zero weights and zero bias -> ReLU(0)=0 and no downstream contribution.
    Layers 1-4 weights are stored in bf16 (MXU-native inputs); biases, the final-layer
    row vector and its bias stay f32."""
    hp = _round_up(hidden_units, 128)
    dh = hp - hidden_units
    bf16 = jnp.bfloat16
    p = {}
    p["w1"] = jnp.pad(params["w1"], ((0, 0), (0, dh))).astype(bf16)
    p["b1"] = jnp.pad(params["b1"], ((0, 0), (0, dh)))
    for i in (2, 3, 4):
        p[f"w{i}"] = jnp.pad(params[f"w{i}"], ((0, dh), (0, dh))).astype(bf16)
        p[f"b{i}"] = jnp.pad(params[f"b{i}"], ((0, 0), (0, dh)))
    # Final layer stored as an f32 (1, hp) row vector so the kernel can do a lane reduction.
    p["w5"] = jnp.pad(params["w5"].T, ((0, 0), (0, dh)))
    p["b5"] = params["b5"]
    return p, hp


def reference_forward_f32(x, params):
    """Full-f32 reference matching the PyTorch module's eval-mode forward."""
    h = x
    for i in range(1, 5):
        h = jnp.maximum(h @ params[f"w{i}"] + params[f"b{i}"], 0.0)
    logits = h @ params["w5"] + params["b5"]
    return jax.nn.sigmoid(logits)


def reference_forward_mixed(x, params):
    """Pure-JAX reference emulating the kernel's bf16-input / f32-accumulate matmuls."""
    bf16 = jnp.bfloat16
    h = x.astype(bf16)
    h_f32 = None
    for i in range(1, 5):
        acc = jnp.dot(h, params[f"w{i}"].astype(bf16),
                      preferred_element_type=jnp.float32)
        h_f32 = jnp.maximum(acc + params[f"b{i}"], 0.0)
        h = h_f32.astype(bf16)
    logits = h_f32 @ params["w5"] + params["b5"]
    return jax.nn.sigmoid(logits)


if __name__ == "__main__":
    key = jax.random.PRNGKey(0)
    batch = 30                # deliberately not a multiple of 8 to exercise batch padding
    input_dimension = 64      # -> hidden_units = 300, padded to 384 for the kernel

    params, hidden_units = init_params(key, input_dimension)
    padded_params, hidden_padded = pad_params(params, hidden_units)

    key, kx = jax.random.split(key)
    x = jax.random.normal(kx, (batch, input_dimension), jnp.float32)

    # Default tb: the >=2-grid-step clamp makes this a 2-step grid at batch=30,
    # exercising the batch pipeline; real workloads use tb=1024-2048.
    out = jax.block_until_ready(emlp_forward(x, padded_params))
    ref_mixed = jax.block_until_ready(reference_forward_mixed(x, params))
    ref_f32 = jax.block_until_ready(reference_forward_f32(x, params))

    assert out.shape == (batch, 1), out.shape
    # Tight check vs. a pure-JAX reference doing the same bf16-input / f32-acc math.
    assert jnp.allclose(out, ref_mixed, atol=2e-3), \
        float(jnp.max(jnp.abs(out - ref_mixed)))
    # Looser check vs. the full-f32 module semantics (bf16 matmul inputs in the kernel).
    assert jnp.allclose(out, ref_f32, atol=2e-2), \
        float(jnp.max(jnp.abs(out - ref_f32)))

    print("KERNEL_OK")
</pallas_src>

<mosaic_0001>
module attributes {stable_mosaic.version = 11 : i64} {
  func.func @_emlp_kernel(%arg0: i32, %arg1: memref<16x64xf32, #tpu.memory_space<vmem>>, %arg2: memref<64x384xbf16, #tpu.memory_space<vmem>>, %arg3: memref<1x384xf32, #tpu.memory_space<vmem>>, %arg4: memref<384x384xbf16, #tpu.memory_space<vmem>>, %arg5: memref<1x384xf32, #tpu.memory_space<vmem>>, %arg6: memref<384x384xbf16, #tpu.memory_space<vmem>>, %arg7: memref<1x384xf32, #tpu.memory_space<vmem>>, %arg8: memref<384x384xbf16, #tpu.memory_space<vmem>>, %arg9: memref<1x384xf32, #tpu.memory_space<vmem>>, %arg10: memref<1x384xf32, #tpu.memory_space<vmem>>, %arg11: memref<1x1xf32, #tpu.memory_space<vmem>>, %arg12: memref<16x1xf32, #tpu.memory_space<vmem>>) attributes {dimension_semantics = [#tpu.dimension_semantics<parallel>], iteration_bounds = array<i64: 2>, scalar_prefetch = 0 : i64, scratch_operands = 0 : i64, tpu.core_type = #tpu.core_type<tc>, window_params = [{transform_indices = @transform_0, window_bounds = array<i64: 16, 64>}, {pipeline_mode = #tpu.pipeline_mode<synchronous>, transform_indices = @transform_1, window_bounds = array<i64: 64, 384>}, {pipeline_mode = #tpu.pipeline_mode<synchronous>, transform_indices = @transform_2, window_bounds = array<i64: 1, 384>}, {pipeline_mode = #tpu.pipeline_mode<synchronous>, transform_indices = @transform_3, window_bounds = array<i64: 384, 384>}, {pipeline_mode = #tpu.pipeline_mode<synchronous>, transform_indices = @transform_4, window_bounds = array<i64: 1, 384>}, {pipeline_mode = #tpu.pipeline_mode<synchronous>, transform_indices = @transform_5, window_bounds = array<i64: 384, 384>}, {pipeline_mode = #tpu.pipeline_mode<synchronous>, transform_indices = @transform_6, window_bounds = array<i64: 1, 384>}, {pipeline_mode = #tpu.pipeline_mode<synchronous>, transform_indices = @transform_7, window_bounds = array<i64: 384, 384>}, {pipeline_mode = #tpu.pipeline_mode<synchronous>, transform_indices = @transform_8, window_bounds = array<i64: 1, 384>}, {pipeline_mode = #tpu.pipeline_mode<synchronous>, transform_indices = @transform_9, window_bounds = array<i64: 1, 384>}, {pipeline_mode = #tpu.pipeline_mode<synchronous>, transform_indices = @transform_10, window_bounds = array<i64: 1, 1>}, {transform_indices = @transform_11, window_bounds = array<i64: 16, 1>}]} {
    %c0 = arith.constant 0 : index
    %c0_0 = arith.constant 0 : index
    %0 = vector.load %arg1[%c0, %c0_0] : memref<16x64xf32, #tpu.memory_space<vmem>>, vector<16x64xf32>
    %1 = arith.truncf %0 : vector<16x64xf32> to vector<16x64xbf16>
    %c0_1 = arith.constant 0 : index
    %c0_2 = arith.constant 0 : index
    %2 = vector.load %arg2[%c0_1, %c0_2] : memref<64x384xbf16, #tpu.memory_space<vmem>>, vector<64x384xbf16>
    %cst = arith.constant dense<0.000000e+00> : vector<16x384xf32>
    %3 = tpu.matmul %1, %2, %cst {dimension_numbers = #tpu.dot_dimension_numbers<[1], [0], [0], [1], [0, 0, 1, 1], [], []>} : vector<16x64xbf16>, vector<64x384xbf16>, vector<16x384xf32> -> vector<16x384xf32>
    %c0_3 = arith.constant 0 : index
    %c0_4 = arith.constant 0 : index
    %4 = vector.load %arg3[%c0_3, %c0_4] : memref<1x384xf32, #tpu.memory_space<vmem>>, vector<1x384xf32>
    %5 = vector.broadcast %4 : vector<1x384xf32> to vector<16x384xf32>
    %6 = arith.addf %3, %5 : vector<16x384xf32>
    %cst_5 = arith.constant 0.000000e+00 : f32
    %7 = vector.broadcast %cst_5 : f32 to vector<16x384xf32>
    %8 = arith.maximumf %6, %7 : vector<16x384xf32>
    %9 = arith.truncf %8 : vector<16x384xf32> to vector<16x384xbf16>
    %c0_6 = arith.constant 0 : index
    %c0_7 = arith.constant 0 : index
    %10 = vector.load %arg4[%c0_6, %c0_7] : memref<384x384xbf16, #tpu.memory_space<vmem>>, vector<384x384xbf16>
    %cst_8 = arith.constant dense<0.000000e+00> : vector<16x384xf32>
    %11 = tpu.matmul %9, %10, %cst_8 {dimension_numbers = #tpu.dot_dimension_numbers<[1], [0], [0], [1], [0, 0, 1, 1], [], []>} : vector<16x384xbf16>, vector<384x384xbf16>, vector<16x384xf32> -> vector<16x384xf32>
    %c0_9 = arith.constant 0 : index
    %c0_10 = arith.constant 0 : index
    %12 = vector.load %arg5[%c0_9, %c0_10] : memref<1x384xf32, #tpu.memory_space<vmem>>, vector<1x384xf32>
    %13 = vector.broadcast %12 : vector<1x384xf32> to vector<16x384xf32>
    %14 = arith.addf %11, %13 : vector<16x384xf32>
    %cst_11 = arith.constant 0.000000e+00 : f32
    %15 = vector.broadcast %cst_11 : f32 to vector<16x384xf32>
    %16 = arith.maximumf %14, %15 : vector<16x384xf32>
    %17 = arith.truncf %16 : vector<16x384xf32> to vector<16x384xbf16>
    %c0_12 = arith.constant 0 : index
    %c0_13 = arith.constant 0 : index
    %18 = vector.load %arg6[%c0_12, %c0_13] : memref<384x384xbf16, #tpu.memory_space<vmem>>, vector<384x384xbf16>
    %cst_14 = arith.constant dense<0.000000e+00> : vector<16x384xf32>
    %19 = tpu.matmul %17, %18, %cst_14 {dimension_numbers = #tpu.dot_dimension_numbers<[1], [0], [0], [1], [0, 0, 1, 1], [], []>} : vector<16x384xbf16>, vector<384x384xbf16>, vector<16x384xf32> -> vector<16x384xf32>
    %c0_15 = arith.constant 0 : index
    %c0_16 = arith.constant 0 : index
    %20 = vector.load %arg7[%c0_15, %c0_16] : memref<1x384xf32, #tpu.memory_space<vmem>>, vector<1x384xf32>
    %21 = vector.broadcast %20 : vector<1x384xf32> to vector<16x384xf32>
    %22 = arith.addf %19, %21 : vector<16x384xf32>
    %cst_17 = arith.constant 0.000000e+00 : f32
    %23 = vector.broadcast %cst_17 : f32 to vector<16x384xf32>
    %24 = arith.maximumf %22, %23 : vector<16x384xf32>
    %25 = arith.truncf %24 : vector<16x384xf32> to vector<16x384xbf16>
    %c0_18 = arith.constant 0 : index
    %c0_19 = arith.constant 0 : index
    %26 = vector.load %arg8[%c0_18, %c0_19] : memref<384x384xbf16, #tpu.memory_space<vmem>>, vector<384x384xbf16>
    %cst_20 = arith.constant dense<0.000000e+00> : vector<16x384xf32>
    %27 = tpu.matmul %25, %26, %cst_20 {dimension_numbers = #tpu.dot_dimension_numbers<[1], [0], [0], [1], [0, 0, 1, 1], [], []>} : vector<16x384xbf16>, vector<384x384xbf16>, vector<16x384xf32> -> vector<16x384xf32>
    %c0_21 = arith.constant 0 : index
    %c0_22 = arith.constant 0 : index
    %28 = vector.load %arg9[%c0_21, %c0_22] : memref<1x384xf32, #tpu.memory_space<vmem>>, vector<1x384xf32>
    %29 = vector.broadcast %28 : vector<1x384xf32> to vector<16x384xf32>
    %30 = arith.addf %27, %29 : vector<16x384xf32>
    %cst_23 = arith.constant 0.000000e+00 : f32
    %31 = vector.broadcast %cst_23 : f32 to vector<16x384xf32>
    %32 = arith.maximumf %30, %31 : vector<16x384xf32>
    %c0_24 = arith.constant 0 : index
    %c0_25 = arith.constant 0 : index
    %33 = vector.load %arg10[%c0_24, %c0_25] : memref<1x384xf32, #tpu.memory_space<vmem>>, vector<1x384xf32>
    %34 = vector.broadcast %33 : vector<1x384xf32> to vector<16x384xf32>
    %35 = arith.mulf %32, %34 : vector<16x384xf32>
    %cst_26 = arith.constant dense<0.000000e+00> : vector<16xf32>
    %36 = vector.multi_reduction <add>, %35, %cst_26 [1] : vector<16x384xf32> to vector<16xf32>
    %37 = vector.shape_cast %36 : vector<16xf32> to vector<16x1xf32>
    %c0_27 = arith.constant 0 : index
    %c0_28 = arith.constant 0 : index
    %38 = vector.load %arg11[%c0_27, %c0_28] : memref<1x1xf32, #tpu.memory_space<vmem>>, vector<1x1xf32>
    %39 = vector.broadcast %38 : vector<1x1xf32> to vector<16x1xf32>
    %40 = arith.addf %37, %39 : vector<16x1xf32>
    %41 = arith.negf %40 : vector<16x1xf32>
    %42 = math.exp %41 : vector<16x1xf32>
    %cst_29 = arith.constant 1.000000e+00 : f32
    %43 = vector.broadcast %cst_29 : f32 to vector<16x1xf32>
    %44 = arith.addf %43, %42 : vector<16x1xf32>
    %45 = arith.divf %43, %44 : vector<16x1xf32>
    %c0_30 = arith.constant 0 : index
    %c0_31 = arith.constant 0 : index
    %46 = vector.load %arg12[%c0_30, %c0_31] : memref<16x1xf32, #tpu.memory_space<vmem>>, vector<16x1xf32>
    tpu.vector_store %arg12[%c0_30, %c0_31], %45 {strides = array<i32>} : memref<16x1xf32, #tpu.memory_space<vmem>>, vector<16x1xf32>,
    return
  }
  func.func @transform_0(%arg0: i32) -> (i32, i32) {
    %c0_i32 = arith.constant 0 : i32
    %c0_i32_0 = arith.constant 0 : i32
    return %arg0, %c0_i32 : i32, i32
  }
  func.func @transform_1(%arg0: i32) -> (i32, i32) {
    %c0_i32 = arith.constant 0 : i32
    %c0_i32_0 = arith.constant 0 : i32
    %c0_i32_1 = arith.constant 0 : i32
    return %c0_i32, %c0_i32_0 : i32, i32
  }
  func.func @transform_2(%arg0: i32) -> (i32, i32) {
    %c0_i32 = arith.constant 0 : i32
    %c0_i32_0 = arith.constant 0 : i32
    %c0_i32_1 = arith.constant 0 : i32
    return %c0_i32, %c0_i32_0 : i32, i32
  }
  func.func @transform_3(%arg0: i32) -> (i32, i32) {
    %c0_i32 = arith.constant 0 : i32
    %c0_i32_0 = arith.constant 0 : i32
    %c0_i32_1 = arith.constant 0 : i32
    return %c0_i32, %c0_i32_0 : i32, i32
  }
  func.func @transform_4(%arg0: i32) -> (i32, i32) {
    %c0_i32 = arith.constant 0 : i32
    %c0_i32_0 = arith.constant 0 : i32
    %c0_i32_1 = arith.constant 0 : i32
    return %c0_i32, %c0_i32_0 : i32, i32
  }
  func.func @transform_5(%arg0: i32) -> (i32, i32) {
    %c0_i32 = arith.constant 0 : i32
    %c0_i32_0 = arith.constant 0 : i32
    %c0_i32_1 = arith.constant 0 : i32
    return %c0_i32, %c0_i32_0 : i32, i32
  }
  func.func @transform_6(%arg0: i32) -> (i32, i32) {
    %c0_i32 = arith.constant 0 : i32
    %c0_i32_0 = arith.constant 0 : i32
    %c0_i32_1 = arith.constant 0 : i32
    return %c0_i32, %c0_i32_0 : i32, i32
  }
  func.func @transform_7(%arg0: i32) -> (i32, i32) {
    %c0_i32 = arith.constant 0 : i32
    %c0_i32_0 = arith.constant 0 : i32
    %c0_i32_1 = arith.constant 0 : i32
    return %c0_i32, %c0_i32_0 : i32, i32
  }
  func.func @transform_8(%arg0: i32) -> (i32, i32) {
    %c0_i32 = arith.constant 0 : i32
    %c0_i32_0 = arith.constant 0 : i32
    %c0_i32_1 = arith.constant 0 : i32
    return %c0_i32, %c0_i32_0 : i32, i32
  }
  func.func @transform_9(%arg0: i32) -> (i32, i32) {
    %c0_i32 = arith.constant 0 : i32
    %c0_i32_0 = arith.constant 0 : i32
    %c0_i32_1 = arith.constant 0 : i32
    return %c0_i32, %c0_i32_0 : i32, i32
  }
  func.func @transform_10(%arg0: i32) -> (i32, i32) {
    %c0_i32 = arith.constant 0 : i32
    %c0_i32_0 = arith.constant 0 : i32
    %c0_i32_1 = arith.constant 0 : i32
    return %c0_i32, %c0_i32_0 : i32, i32
  }
  func.func @transform_11(%arg0: i32) -> (i32, i32) {
    %c0_i32 = arith.constant 0 : i32
    %c0_i32_0 = arith.constant 0 : i32
    return %arg0, %c0_i32 : i32, i32
  }
}

</mosaic_0001>

<bundles_post_ra>
// kernel: tpu_custom_call.1
= control target key start
LH: loop header
LB: loop body
LE: loop exit
PB: predicated region body
PF: predicated region fallthrough
CT: control target
= control target key end

     0   :  { %s4277_s0 = inlined_call_operand.hbm [shape: f32[32,64], index: 0, kind: input, shape index: {}]   ;;  %s4278_s1 = inlined_call_operand.hbm [shape: bf16[64,384], index: 1, kind: input, shape index: {}]   ;;  %s4279_s2 = inlined_call_operand.vmem [shape: f32[1,384], index: 2, kind: input, shape index: {}]   ;;  %s4280_s3 = inlined_call_operand.hbm [shape: bf16[384,384], index: 3, kind: input, shape index: {}]   ;;  %s4281_s4 = inlined_call_operand.vmem [shape: f32[1,384], index: 4, kind: input, shape index: {}]   ;;  %s4282_s5 = inlined_call_operand.hbm [shape: bf16[384,384], index: 5, kind: input, shape index: {}]   ;;  %s4283_s6 = inlined_call_operand.vmem [shape: f32[1,384], index: 6, kind: input, shape index: {}]   ;;  %s4284_s7 = inlined_call_operand.hbm [shape: bf16[384,384], index: 7, kind: input, shape index: {}]   ;;  %s4285_s8 = inlined_call_operand.vmem [shape: f32[1,384], index: 8, kind: input, shape index: {}]   ;;  %s4286_s9 = inlined_call_operand.vmem [shape: f32[1,384], index: 9, kind: input, shape index: {}]   ;;  %s4287_s10 = inlined_call_operand.<no memory space> [shape: f32[1,1], index: 10, kind: input, shape index: {}]   ;;  %s4288_s11 = inlined_call_operand.vmem [shape: f32[32,1], index: 11, kind: output, shape index: {}]  }
   0x1   :  { %4294 = sst [smem:[#allocation14_spill]] %s4286_s9  ;;  %v16_v0 = vstv %s4287_s10 }
   0x2   :  { %4295 = sst [smem:[#allocation15_spill]] %s4288_s11  ;;  %17 = vst [vmem:[#allocation2] sm:$0x1] %v16_v0 }
   0x3   :  { %18 = vsyncpa [#allocation4], 0 }
   0x4   :  { %20 = vsyncpa [#allocation4 + $0x1], 0 }
   0x5   :  { %21 = vsyncpa [#allocation6], 0 }
   0x6   :  { %22 = vsyncpa [#allocation9], 0  ;;  %s3955_s19 = smov 0   ;;  %s3957_s20 = smov 0  }
   0x7   :  { %s3959_s21 = smov 0   ;;  %s3961_s22 = smov 0  }
   0x8 LB: > { %s4291_s10 = sadd.s32 4294967295, %s3878_s22   ;;  %p48_p0 = scmp.ne.s32.totalorder %s3870_s20, %s3866_s19  ;;  %s3878_s22 = sphi %s3961_s22, %s4308_s22   ;;  %s3874_s21 = sphi %s3959_s21, %s4311_s21   ;;  %s3870_s20 = sphi %s3957_s20, %s4310_s20   ;;  %s3866_s19 = sphi %s3955_s19, %s4309_s19  }
   0x9   : > { %p3977_p1 = scmp.eq.s32.totalorder %s4291_s10, 0  ;;  %p2848_p2 = scmp.ge.s32.totalorder %s3878_s22, 1 }
   0xa   : > { %p295_p3 = scmp.lt.s32.totalorder %s3878_s22, 3  ;;  %s3880_s26 = smov [#allocation5]  }
   0xb   : > { %s4296_s23 = scalar_select %p3977_p1, 1, 0 }
   0xc   : > { %p3985_p4 = por %p3977_p1, %p48_p0  ;;  %p3989_p5 = pnand %p2848_p2, %p295_p3 }
   0xd   : > { %s307_s27 = sshll.u32 %s3880_s26, 4  ;;  %s3881_s29 = smov [#allocation8]   ;;  %s3993_s27 = int_to_ptr.vmem [resolvable:$true] %s307_s27 }
   0xe   : > { %s4297_s24 = scalar_select %p3985_p4, 1, 0 }
   0xf   : > { %s4298_s25 = scalar_select %p3989_p5, 1, 0 }
  0x10   : > { %p3313_p6 = pneg %p3989_p5  ;;  %s339_s30 = sshll.u32 %s3881_s29, 4  ;;  %s4003_s30 = int_to_ptr.vmem [resolvable:$true] %s339_s30 }
  0x11   : > { %s3882_s12 = smov [#allocation7]   ;;  %s3694_s16 = scalar_lea.hbm %s4278_s1, 1536 }
  0x12   : > { %p3999_p7 = pnand %p3313_p6, %p3977_p1  ;;  %s4005_s13 = sshll.u32 %s3882_s12, 4  ;;  %s324_s13 = int_to_ptr.vmem [resolvable:$true] %s4005_s13 }
  0x13   : > { %p3695_p8 = scmp.ne.s32.totalorder %s4278_s1, %s3694_s16  ;;  %p3701_p12 = scmp.lt.u32.totalorder %s3694_s16, %s4278_s1 }
  0x14   : > { %p4015_p9 = pneg %p3999_p7 }
  0x16   : > { %p3697_p10 = pnand %p4015_p9, %p3695_p8 }
  0x18   : > { %p3698_p11 = pneg %p3697_p10 }
  0x1a   : > { %p3703_p13 = pnand %p3701_p12, %p3698_p11 }
  0x1c   : > { %3706 = shalt.err (!%p3703_p13)
}
  0x1d   : > { %s3707_s12 = scalar_lea.vmem %s3993_s27, 1536  ;;  %p3715_p6 = scmp.lt.s32.totalorder %s3993_s27, %s3993_s27 }
  0x1e   : > { %p3708_p0 = scmp.ne.s32.totalorder %s3993_s27, %s3707_s12  ;;  %p3716_p1 = scmp.lt.s32.totalorder %s3707_s12, %s3707_s12 }
  0x20   : > { %p3710_p2 = pnand %p3708_p0, %p4015_p9  ;;  %p3717_p8 = por %p3716_p1, %p3715_p6 }
  0x22   : > { %p3711_p3 = pneg %p3710_p2 }
  0x24   : > { %p3718_p10 = pnand %p3717_p8, %p3711_p3 }
  0x26   : > { %3721 = shalt.err (!%p3718_p10)
}
  0x27   : > { %s3883_s14 = smov 192   ;;  %s3884_s15 = smov 12  }
  0x28   : > { %3316 = dma.hbm_to_vmem [thread:$0]  (!%p3999_p7), %s4278_s1, 1536, %s3993_s27, [#allocation6], %s3883_s14, %s3883_s14, %s3884_s15  }
  0x29   : > { %s3722_s29 = scalar_lea.hbm %s4282_s5, 9216 }
  0x2a   : > { %p3723_p1 = scmp.ne.s32.totalorder %s4282_s5, %s3722_s29  ;;  %p3729_p13 = scmp.lt.u32.totalorder %s3722_s29, %s4282_s5 }
  0x2c   : > { %p3725_p11 = pnand %p3723_p1, %p4015_p9 }
  0x2e   : > { %p3726_p12 = pneg %p3725_p11 }
  0x30   : > { %p3731_p0 = pnand %p3729_p13, %p3726_p12 }
  0x32   : > { %3734 = shalt.err (!%p3731_p0)
}
  0x33   : > { %s3735_s27 = scalar_lea.vmem %s4003_s30, 9216  ;;  %p3743_p8 = scmp.lt.s32.totalorder %s4003_s30, %s4003_s30 }
  0x34   : > { %p3736_p2 = scmp.ne.s32.totalorder %s4003_s30, %s3735_s27  ;;  %p3744_p10 = scmp.lt.s32.totalorder %s3735_s27, %s3735_s27 }
  0x36   : > { %p3738_p3 = pnand %p3736_p2, %p4015_p9  ;;  %p3745_p1 = por %p3744_p10, %p3743_p8 }
  0x38   : > { %p3739_p6 = pneg %p3738_p3 }
  0x3a   : > { %p3746_p11 = pnand %p3745_p1, %p3739_p6 }
  0x3c   : > { %3749 = shalt.err (!%p3746_p11)
}
  0x3d   : > { %3322 = dma.hbm_to_vmem [thread:$0]  (!%p3999_p7), %s4282_s5, 9216, %s4003_s30, [#allocation9], %s3883_s14, %s3883_s14, %s3884_s15  }
  0x3e   : > { %s3750_s17 = scalar_lea.hbm %s4280_s3, 9216 }
  0x3f   : > { %p3751_p12 = scmp.ne.s32.totalorder %s4280_s3, %s3750_s17  ;;  %p3757_p2 = scmp.lt.u32.totalorder %s3750_s17, %s4280_s3 }
  0x41   : > { %p3753_p13 = pnand %p3751_p12, %p4015_p9 }
  0x43   : > { %p3754_p0 = pneg %p3753_p13 }
  0x45   : > { %p3759_p3 = pnand %p3757_p2, %p3754_p0 }
  0x47   : > { %3762 = shalt.err (!%p3759_p3)
}
  0x48   : > { %s3763_s27 = scalar_lea.vmem %s324_s13, 9216  ;;  %p3771_p1 = scmp.lt.s32.totalorder %s324_s13, %s324_s13 }
  0x49   : > { %p3764_p6 = scmp.ne.s32.totalorder %s324_s13, %s3763_s27  ;;  %p3772_p11 = scmp.lt.s32.totalorder %s3763_s27, %s3763_s27 }
  0x4b   : > { %p3766_p8 = pnand %p3764_p6, %p4015_p9  ;;  %p3773_p4 = por %p3772_p11, %p3771_p1 }
  0x4d   : > { %p3767_p10 = pneg %p3766_p8 }
  0x4f   : > { %p3774_p5 = pnand %p3773_p4, %p3767_p10 }
  0x51   : > { %3777 = shalt.err (!%p3774_p5)
}
  0x52   : > { %3319 = dma.hbm_to_vmem [thread:$0]  (!%p3999_p7), %s4280_s3, 9216, %s324_s13, [#allocation6], %s3883_s14, %s3883_s14, %s3884_s15  }
  0x53   : > { %s3885_s11 = smov [#allocation10]   ;;  %s3778_s18 = scalar_lea.hbm %s4284_s7, 9216 }
  0x54   : > { %s355_s10 = sshll.u32 %s3885_s11, 4  ;;  %p3779_p4 = scmp.ne.s32.totalorder %s4284_s7, %s3778_s18  ;;  %s356_s10 = int_to_ptr.vmem [resolvable:$true] %s355_s10 }
  0x55   : > { %p3785_p13 = scmp.lt.u32.totalorder %s3778_s18, %s4284_s7 }
  0x56   : > { %p3781_p5 = pnand %p3779_p4, %p4015_p9 }
  0x58   : > { %p3782_p12 = pneg %p3781_p5 }
  0x5a   : > { %p3787_p0 = pnand %p3785_p13, %p3782_p12 }
  0x5c   : > { %3790 = shalt.err (!%p3787_p0)
}
  0x5d   : > { %s3791_s13 = scalar_lea.vmem %s356_s10, 9216  ;;  %p3799_p8 = scmp.lt.s32.totalorder %s356_s10, %s356_s10 }
  0x5e   : > { %p3792_p2 = scmp.ne.s32.totalorder %s356_s10, %s3791_s13  ;;  %p3800_p10 = scmp.lt.s32.totalorder %s3791_s13, %s3791_s13 }
  0x60   : > { %p3794_p3 = pnand %p3792_p2, %p4015_p9  ;;  %p3801_p1 = por %p3800_p10, %p3799_p8 }
  0x62   : > { %p3795_p6 = pneg %p3794_p3 }
  0x64   : > { %p3802_p11 = pnand %p3801_p1, %p3795_p6 }
  0x66   : > { %3805 = shalt.err (!%p3802_p11)
}
  0x67   : > { %3325 = dma.hbm_to_vmem [thread:$0]  (!%p3999_p7), %s4284_s7, 9216, %s356_s10, [#allocation9], %s3883_s14, %s3883_s14, %s3884_s15  }
  0x68   : > { %s4109_s19 = sadd.s32 1, %s3878_s22   ;;  %s35_s28 = sadd.s32 1, %s3874_s21 }
  0x69   : > { %s32_s11 = ssub.s32 %s3878_s22, %s4109_s19  ;;  %p42_p9 = scmp.ne.s32.totalorder %s3874_s21, %s3870_s20 }
  0x6a   : > { %p33_p4 = scmp.eq.s32.totalorder %s32_s11, 0  ;;  %p43_p5 = scmp.eq.s32.totalorder %s3878_s22, 0 }
  0x6b   : > { %p3334_p12 = scmp.lt.s32.totalorder %s3878_s22, 2  ;;  %s378_s16 = sand.u32 1, %s3874_s21  }
  0x6c   : > { %s4120_s17 = scalar_select %p33_p4, %s3874_s21, %s35_s28  }
  0x6d   : > { %p44_p13 = por %p43_p5, %p42_p9  ;;  %s2854_s18 = sshll.u32 %s378_s16, 4 }
  0x6e   : > { %s3100_s26 = sshll.u32 %s3878_s22, 8  ;;  %s382_s14 = scalar_lea.vmem [#allocation3], %s2854_s18 }
  0x6f   : > { %s4126_s27 = scalar_lea.hbm %s4277_s0, %s3100_s26  ;;  %s389_s15 = sshll.u32 %s382_s14, 4  ;;  %s4132_s15 = int_to_ptr.vmem [resolvable:$true] %s389_s15 }
  0x70   : > { %p4128_p7 = pnand %p3334_p12, %p44_p13  ;;  %s4134_s13 = scalar_lea.sflag [#allocation4], %s378_s16 }
  0x71   : > { %s3806_s30 = scalar_lea.hbm %s4126_s27, 256  ;;  %s3811_s11 = scalar_lea.hbm %s4277_s0, 512 }
  0x72   : > { %p3807_p0 = scmp.ne.s32.totalorder %s4126_s27, %s3806_s30  ;;  %p3808_p2 = pneg %p4128_p7 }
  0x73   : > { %p3812_p8 = scmp.lt.u32.totalorder %s4126_s27, %s4277_s0  ;;  %p3813_p10 = scmp.lt.u32.totalorder %s3811_s11, %s3806_s30 }
  0x74   : > { %p3809_p3 = pnand %p3808_p2, %p3807_p0  ;;  %p3815_p11 = scmp.lt.u32.totalorder %s3806_s30, %s4126_s27 }
  0x75   : > { %p3814_p1 = por %p3813_p10, %p3812_p8 }
  0x76   : > { %p3810_p6 = pneg %p3809_p3 }
  0x77   : > { %p3816_p9 = por %p3815_p11, %p3814_p1 }
  0x79   : > { %p3817_p4 = pnand %p3816_p9, %p3810_p6 }
  0x7b   : > { %3820 = shalt.err (!%p3817_p4)
}
  0x7c   : > { %s3821_s16 = scalar_lea.vmem %s4132_s15, 256  ;;  %s3886_s29 = smov [#allocation3]  }
  0x7d   : > { %p3822_p5 = scmp.ne.s32.totalorder %s4132_s15, %s3821_s16  ;;  %s3826_s12 = sshll.u32 %s3886_s29, 4  ;;  %s3827_s12 = int_to_ptr.vmem [resolvable:$false] %s3826_s12 }
  0x7e   : > { %s3828_s14 = scalar_lea.vmem %s3827_s12, 512  ;;  %p3829_p0 = scmp.lt.s32.totalorder %s4132_s15, %s3827_s12 }
  0x7f   : > { %p3824_p12 = pnand %p3822_p5, %p3808_p2  ;;  %p3830_p3 = scmp.lt.s32.totalorder %s3828_s14, %s3821_s16 }
  0x81   : > { %p3825_p13 = pneg %p3824_p12  ;;  %p3831_p8 = por %p3830_p3, %p3829_p0 }
  0x83   : > { %p3832_p10 = pnand %p3831_p8, %p3825_p13 }
  0x85   : > { %3835 = shalt.err (!%p3832_p10)
}
  0x86   : > { %s3887_s30 = smov 128   ;;  %s3888_s9 = smov 8  }
  0x87   : > { %3329 = dma.hbm_to_vmem [thread:$0]  (!%p4128_p7), %s4126_s27, 256, %s4132_s15, %s4134_s13, %s3887_s30, %s3887_s30, %s3888_s9  }
  0x88   : > { %p4302_p2 = scmp.ne.s32.totalorder %s4298_s25, 0 }
  0x89   : > { %s403_s28 = sand.u32 (!%p4302_p2), 1, %s3870_s20   ;;  %p4303_p6 = scmp.ne.s32.totalorder (!%p4302_p2), %s4297_s24, 0 }
  0x8a   : > { %401 = sbr.rel (%p4302_p2) target bundleno = 1328 (0x530), region = 64  ;;  %s2858_s11 = sshll.u32 (!%p4302_p2), %s403_s28, 4 }
  0x8b   : > { %s404_s18 = scalar_lea.sflag (!%p4302_p2), [#allocation4], %s403_s28  ;;  %s407_s26 = scalar_lea.vmem (!%p4302_p2), [#allocation3], %s2858_s11 }
  0x91   : > { %3853 = dma.done.wait (%p4303_p6), %s404_s18, 256  }
  0x92   : > { %3855 = vsyncadd (%p4303_p6), %s404_s18, 4294967040  ;;  %p4304_p1 = scmp.ne.s32.totalorder %s4296_s23, 0 }
  0x94   : > { %3857 = dma.done.wait (%p4304_p1), [#allocation6], 10752  }
  0x95   : > { %3859 = vsyncadd (%p4304_p1), [#allocation6], 4294956544 }
  0x96   : > { %3861 = dma.done.wait (%p4304_p1), [#allocation9], 18432  }
  0x97   : > { %3863 = vsyncadd (%p4304_p1), [#allocation9], 4294948864  ;;  %v3889_v1 = vmov 0   ;;  %v3382_v2 = vld [vmem:[#allocation5 + $0x4] ss:$12 sps:$4 sm:$0xff]   ;;  %v471_v11 = vld [vmem:[%s407_s26 + $0x8] sm:$0xff] }
  0x98   : > { %606 = vmatprep.mubr.bf16.mxu1 %v3889_v1  ;;  %v3384_v3 = vld [vmem:[#allocation5] ss:$12 sps:$4 sm:$0xff]   ;;  %574 = vmatprep.subr.bf16.mxu1 %v3382_v2  ;;  %v3385_v4 = vld [vmem:[#allocation5 + $0x1c] ss:$12 sps:$4 sm:$0xff]   ;;  %v3387_v5 = vld [vmem:[#allocation5 + $0x18] ss:$12 sps:$4 sm:$0xff]  }
  0x99   : > { %575 = vmatpush1.bf16.msra.mxu1 %v3384_v3  ;;  %v3388_v6 = vld [vmem:[#allocation5 + $0x34] ss:$12 sps:$4 sm:$0xff]   ;;  %v3390_v7 = vld [vmem:[#allocation5 + $0x30] ss:$12 sps:$4 sm:$0xff]   ;;  %v3391_v8 = vld [vmem:[#allocation5 + $0x4c] ss:$12 sps:$4 sm:$0xff]  }
  0x9a   : > { %576 = vmatprep.subr.bf16.mxu1 %v3385_v4  ;;  %v3393_v9 = vld [vmem:[#allocation5 + $0x48] ss:$12 sps:$4 sm:$0xff]   ;;  %v3398_v12 = vld [vmem:[#allocation7 + $0x4] ss:$12 sps:$4 sm:$0xff]   ;;  %v3400_v13 = vld [vmem:[#allocation7] ss:$12 sps:$4 sm:$0xff]   ;;  %v491_v4 = vlaneseq }
  0x9b   : > { %v470_v10 = vld [vmem:[%s407_s26] sm:$0xff]  ;;  %1164 = vmatprep.subr.bf16.mxu0 %v3398_v12  ;;  %v3401_v14 = vld [vmem:[#allocation7 + $0x1c] ss:$12 sps:$4 sm:$0xff]   ;;  %vm570_vm0 = vcmask 523264   ;;  %v3890_v19 = vmov 0.0   ;;  %vm3891_vm1 = vmmov 0  }
  0x9c   : > { %1165 = vmatpush1.bf16.msra.mxu0 %v3400_v13  ;;  %v3403_v15 = vld [vmem:[#allocation7 + $0x18] ss:$12 sps:$4 sm:$0xff]   ;;  %v472_v16 = vpack.c.bf16 %v471_v11, %v470_v10  ;;  %v3404_v17 = vld [vmem:[#allocation7 + $0x34] ss:$12 sps:$4 sm:$0xff]   ;;  %v3406_v20 = vld [vmem:[#allocation7 + $0x30] ss:$12 sps:$4 sm:$0xff]  }
  0x9d   : > { %577 = vmatpush1.bf16.msra.mxu1 %v3387_v5  ;;  %1166 = vmatprep.subr.bf16.mxu0 %v3401_v14  ;;  %v3394_v18 = vld [vmem:[#allocation5 + $0x8] ss:$12 sps:$4 sm:$0xff]   ;;  %v3407_v21 = vld [vmem:[#allocation7 + $0x4c] ss:$12 sps:$4 sm:$0xff]   ;;  %v3410_v24 = vld [vmem:[#allocation7 + $0x64] ss:$12 sps:$4 sm:$0xff]  }
  0x9e   : > { %578 = vmatprep.subr.bf16.mxu1 %v3388_v6  ;;  %v3395_v22 = vld [vmem:[#allocation5 + $0x20] ss:$12 sps:$4 sm:$0xff]   ;;  %v3409_v23 = vld [vmem:[#allocation7 + $0x48] ss:$12 sps:$4 sm:$0xff]   ;;  %v3396_v25 = vld [vmem:[#allocation5 + $0x38] ss:$12 sps:$4 sm:$0xff]  }
  0x9f   : > { %v3412_v26 = vld [vmem:[#allocation7 + $0x60] ss:$12 sps:$4 sm:$0xff]   ;;  %v3413_v27 = vld [vmem:[#allocation7 + $0x7c] ss:$12 sps:$4 sm:$0xff]   ;;  %v3415_v30 = vld [vmem:[#allocation7 + $0x78] ss:$12 sps:$4 sm:$0xff]  }
  0xa0   : > { %1167 = vmatpush1.bf16.msra.mxu0 %v3403_v15  ;;  %v3397_v28 = vld [vmem:[#allocation5 + $0x50] ss:$12 sps:$4 sm:$0xff]   ;;  %v3424_v29 = vld [vmem:[#allocation7 + $0xc8] ss:$12 sps:$4 sm:$0xff]   ;;  %v3429_v33 = vld [vmem:[#allocation7 + $0xe0] ss:$12 sps:$4 sm:$0xff]  }
  0xa1   : > { %579 = vmatpush1.bf16.msra.mxu1 %v3390_v7  ;;  %1168 = vmatprep.subr.bf16.mxu0 %v3404_v17  ;;  %v3416_v31 = vld [vmem:[#allocation7 + $0x94] ss:$12 sps:$4 sm:$0xff]   ;;  %v3418_v34 = vld [vmem:[#allocation7 + $0x90] ss:$12 sps:$4 sm:$0xff]   ;;  %v3419_v35 = vld [vmem:[#allocation7 + $0xac] ss:$12 sps:$4 sm:$0xff]  }
  0xa2   : > { %580 = vmatprep.subr.bf16.mxu1 %v3391_v8  ;;  %v3426_v32 = vld [vmem:[#allocation7 + $0x8] ss:$12 sps:$4 sm:$0xff]   ;;  %v3431_v36 = vld [vmem:[#allocation7 + $0x20] ss:$12 sps:$4 sm:$0xff]   ;;  %v3434_v37 = vld [vmem:[#allocation7 + $0xf8] ss:$12 sps:$4 sm:$0xff]  }
  0xa3   : > { %v3421_v38 = vld [vmem:[#allocation7 + $0xa8] ss:$12 sps:$4 sm:$0xff]   ;;  %v3422_v39 = vld [vmem:[#allocation7 + $0xc4] ss:$12 sps:$4 sm:$0xff]   ;;  %v3425_v40 = vld [vmem:[#allocation7 + $0xc0] ss:$12 sps:$4 sm:$0xff]  }
  0xa4   : > { %1169 = vmatpush1.bf16.msra.mxu0 %v3406_v20  ;;  %v3436_v41 = vld [vmem:[#allocation7 + $0x38] ss:$12 sps:$4 sm:$0xff]   ;;  %v3427_v42 = vld [vmem:[#allocation7 + $0xdc] ss:$12 sps:$4 sm:$0xff]   ;;  %v3432_v47 = vld [vmem:[#allocation7 + $0xf4] ss:$12 sps:$4 sm:$0xff]  }
  0xa5   : > { %581 = vmatpush1.bf16.msra.mxu1 %v3393_v9  ;;  %1170 = vmatprep.subr.bf16.mxu0 %v3407_v21  ;;  %v3439_v43 = vld [vmem:[#allocation7 + $0x110] ss:$12 sps:$4 sm:$0xff]   ;;  %v3444_v45 = vld [vmem:[#allocation7 + $0x128] ss:$12 sps:$4 sm:$0xff]   ;;  %v3430_v46 = vld [vmem:[#allocation7 + $0xd8] ss:$12 sps:$4 sm:$0xff]  }
  0xa6   : > { %3199 = vmatprep.subr.bf16.mxu1 %v3890_v19  ;;  %v3441_v44 = vld [vmem:[#allocation7 + $0x50] ss:$12 sps:$4 sm:$0xff]   ;;  %v3446_v48 = vld [vmem:[#allocation7 + $0x68] ss:$12 sps:$4 sm:$0xff]   ;;  %v3449_v49 = vld [vmem:[#allocation7 + $0x140] ss:$12 sps:$4 sm:$0xff]  }
  0xa7   : > { %v3435_v50 = vld [vmem:[#allocation7 + $0xf0] ss:$12 sps:$4 sm:$0xff]   ;;  %v3437_v51 = vld [vmem:[#allocation7 + $0x10c] ss:$12 sps:$4 sm:$0xff]   ;;  %v3440_v53 = vld [vmem:[#allocation7 + $0x108] ss:$12 sps:$4 sm:$0xff]  }
  0xa8   : > { %2877 = vmatmul.mubr.msk.bf16.vlgmr.msra.gmra.mrb[0].mxu1 %vm570_vm0, %v472_v16  ;;  %1171 = vmatpush1.bf16.msra.mxu0 %v3409_v23  ;;  %v3451_v52 = vld [vmem:[#allocation7 + $0x80] ss:$12 sps:$4 sm:$0xff]   ;;  %v3442_v54 = vld [vmem:[#allocation7 + $0x124] ss:$12 sps:$4 sm:$0xff]   ;;  %v3447_v56 = vld [vmem:[#allocation7 + $0x13c] ss:$12 sps:$4 sm:$0xff]  }
  0xa9   : > { %3200 = vmatpush3.bf16.msra.mxu1 %v3394_v18  ;;  %3207 = vmatprep.mubr.msk.bf16.mxu1 %vm3891_vm1, %v3890_v19  ;;  %v3445_v55 = vld [vmem:[#allocation7 + $0x120] ss:$12 sps:$4 sm:$0xff]   ;;  %v3450_v57 = vld [vmem:[#allocation7 + $0x138] ss:$12 sps:$4 sm:$0xff]   ;;  %v3455_v60 = vld [vmem:[#allocation7 + $0x150] ss:$12 sps:$4 sm:$0xff]  }
  0xaa   : > { %3201 = vmatprep.subr.bf16.mxu1 %v3890_v19  ;;  %1172 = vmatprep.subr.bf16.mxu0 %v3410_v24  ;;  %v3452_v58 = vld [vmem:[#allocation7 + $0x154] ss:$12 sps:$4 sm:$0xff]   ;;  %v3454_v59 = vld [vmem:[#allocation7 + $0x158] ss:$12 sps:$4 sm:$0xff]   ;;  %v3459_v63 = vld [vmem:[#allocation7 + $0x170] ss:$12 sps:$4 sm:$0xff]  }
  0xab   : > { %v3456_v61 = vld [vmem:[#allocation7 + $0x98] ss:$12 sps:$4 sm:$0xff]   ;;  %v3460_v0 = vld [vmem:[#allocation7 + $0x168] ss:$12 sps:$4 sm:$0xff]   ;;  %v3461_v2 = vld [vmem:[#allocation7 + $0xb0] ss:$12 sps:$4 sm:$0xff]  }
  0xac   : > { %1173 = vmatpush1.bf16.msra.mxu0 %v3412_v26  ;;  %v3457_v62 = vld [vmem:[#allocation7 + $0x16c] ss:$12 sps:$4 sm:$0xff]   ;;  %v3464_v3 = vld [vmem:[#allocation7 + $0x184] ss:$12 sps:$4 sm:$0xff]   ;;  %v492_v5 = vshrl.u32 %v491_v4, 7  ;;  %s4305_s14 = sld [smem:[#allocation14_spill]] }
  0xad   : > { %3202 = vmatpush3.bf16.msra.mxu1 %v3395_v22  ;;  %1174 = vmatprep.subr.bf16.mxu0 %v3413_v27  ;;  %v489_v7 = vld [vmem:[%s4279_s2] sm:$0x7]  ;;  %v3465_v27 = vld [vmem:[#allocation7 + $0x188] ss:$12 sps:$4 sm:$0xff]   ;;  %s4306_s30 = sadd.s32 4294967295, %s3878_s22   ;;  %s4307_s26 = sld [smem:[#allocation15_spill]] }
  0xae   : > { %3203 = vmatprep.subr.bf16.mxu1 %v3890_v19  ;;  %v4187_v6 = vsub.s32 0, %v492_v5  ;;  %v4192_v8 = vsub.s32 1, %v492_v5  ;;  %v3462_v26 = vld [vmem:[#allocation7 + $0x180] ss:$12 sps:$4 sm:$0xff]   ;;  %v3503_v4 = vld [vmem:[#allocation8 + $0x48] ss:$12 sps:$4 sm:$0xff]  }
  0xaf   : > { %s2863_s9 = sshll.u32 %s4306_s30, 1  ;;  %vm2738_vm2 = vcmask 7168  }
  0xb0   : > { %1175 = vmatpush1.bf16.msra.mxu0 %v3415_v30  ;;  %v494_v9 = vrot.slane %v489_v7, %v4187_v6  ;;  %v498_v10 = vrot.slane %v489_v7, %v4192_v8  ;;  %v3466_v30 = vld [vmem:[#allocation7 + $0x198] ss:$12 sps:$4 sm:$0xff]   ;;  %p464_p7 = scmp.lt.s32.totalorder %s2863_s9, 3 }
  0xb1   : > { %3204 = vmatpush3.bf16.msra.mxu1 %v3396_v25  ;;  %1176 = vmatprep.subr.bf16.mxu0 %v3416_v31  ;;  %v3469_v31 = vld [vmem:[#allocation7 + $0x1a0] ss:$12 sps:$4 sm:$0xff]  }
  0xb2   : > { %3205 = vmatprep.subr.bf16.mxu1 %v3890_v19  ;;  %s4313_s9 = smov (!%p464_p7, %s2863_s9), 3 }
  0xb3   : > { %s2864_s28 = sshll.u32 %s4313_s9, 3 }
  0xb4   : > { %1177 = vmatpush1.bf16.msra.mxu0 %v3418_v34  ;;  %v3470_v34 = vld [vmem:[#allocation7 + $0x1b0] ss:$12 sps:$4 sm:$0xff]   ;;  %s467_s23 = scalar_lea.vmem %s4307_s26, %s2864_s28 }
  0xb5   : > { %3206 = vmatpush3.bf16.msra.mxu1 %v3397_v28  ;;  %1178 = vmatprep.subr.bf16.mxu0 %v3419_v35  ;;  %v3468_v28 = vld [vmem:[#allocation7 + $0x19c] ss:$12 sps:$4 sm:$0xff]   ;;  %v3473_v35 = vld [vmem:[#allocation7 + $0x1b8] ss:$12 sps:$4 sm:$0xff]  }
  0xb6   : > { %3106 = vmatprep.subr.bf16.mxu1 %v3424_v29  ;;  %v4196_v29 = vsub.s32 2, %v492_v5  ;;  %v3508_v5 = vld [vmem:[#allocation8 + $0x64] ss:$12 sps:$4 sm:$0xff]  }
  0xb8   : > { %3208 = vmatmul.mubr.msk.bf16.vlgmr.msra.gmra.mrb[4].mxu1 %vm570_vm0, %v472_v16  ;;  %1179 = vmatpush1.bf16.msra.mxu0 %v3421_v38 }
  0xb9   : > { %3107 = vmatpush3.bf16.msra.mxu1 %v3426_v32  ;;  %1180 = vmatprep.subr.bf16.mxu0 %v3422_v39  ;;  %v3472_v32 = vld [vmem:[#allocation7 + $0x1b4] ss:$12 sps:$4 sm:$0xff]  }
  0xba   : > { %3108 = vmatprep.subr.bf16.mxu1 %v3429_v33  ;;  %v502_v33 = vrot.slane %v489_v7, %v4196_v29  ;;  %v3506_v7 = vld [vmem:[#allocation8 + $0x60] ss:$12 sps:$4 sm:$0xff]  }
  0xbc   : > { %1181 = vmatpush1.bf16.msra.mxu0 %v3425_v40 }
  0xbd   : > { %3109 = vmatpush3.bf16.msra.mxu1 %v3431_v36  ;;  %1182 = vmatprep.subr.bf16.mxu0 %v3427_v42 }
  0xbe   : > { %3110 = vmatprep.subr.bf16.mxu1 %v3434_v37  ;;  %v3476_v37 = vld [vmem:[#allocation7 + $0x1cc] ss:$12 sps:$4 sm:$0xff]  }
  0xc0   : > { %1183 = vmatpush1.bf16.msra.mxu0 %v3430_v46  ;;  %v3480_v46 = vld [vmem:[#allocation7 + $0x1e4] ss:$12 sps:$4 sm:$0xff]  }
  0xc1   : > { %3111 = vmatpush3.bf16.msra.mxu1 %v3436_v41  ;;  %1184 = vmatprep.subr.bf16.mxu0 %v3432_v47 }
  0xc2   : > { %3112 = vmatprep.subr.bf16.mxu1 %v3439_v43 }
  0xc4   : > { %1185 = vmatpush1.bf16.msra.mxu0 %v3435_v50  ;;  %v3481_v50 = vld [vmem:[#allocation7 + $0x1e8] ss:$12 sps:$4 sm:$0xff]  }
  0xc5   : > { %3113 = vmatpush3.bf16.msra.mxu1 %v3441_v44  ;;  %1186 = vmatprep.subr.bf16.mxu0 %v3437_v51  ;;  %v3474_v44 = vld [vmem:[#allocation7 + $0x1c8] ss:$12 sps:$4 sm:$0xff]  }
  0xc6   : > { %3114 = vmatprep.subr.bf16.mxu1 %v3444_v45  ;;  %v3477_v45 = vld [vmem:[#allocation7 + $0x1d0] ss:$12 sps:$4 sm:$0xff]  }
  0xc7   : > { %v3484_v51 = vld [vmem:[#allocation7 + $0x1fc] ss:$12 sps:$4 sm:$0xff]  }
  0xc8   : > { %1187 = vmatpush1.bf16.msra.mxu0 %v3440_v53  ;;  %v3485_v53 = vld [vmem:[#allocation7 + $0x200] ss:$12 sps:$4 sm:$0xff]  }
  0xc9   : > { %3115 = vmatpush3.bf16.msra.mxu1 %v3446_v48  ;;  %1188 = vmatprep.subr.bf16.mxu0 %v3442_v54  ;;  %v3488_v54 = vld [vmem:[#allocation7 + $0x214] ss:$12 sps:$4 sm:$0xff]  }
  0xca   : > { %3116 = vmatprep.subr.bf16.mxu1 %v3449_v49  ;;  %v3478_v49 = vld [vmem:[#allocation7 + $0x1e0] ss:$12 sps:$4 sm:$0xff]  }
  0xcc   : > { %1189 = vmatpush1.bf16.msra.mxu0 %v3445_v55  ;;  %v3486_v55 = vld [vmem:[#allocation7 + $0x210] ss:$12 sps:$4 sm:$0xff]  }
  0xcd   : > { %3117 = vmatpush3.bf16.msra.mxu1 %v3451_v52  ;;  %1190 = vmatprep.subr.bf16.mxu0 %v3447_v56  ;;  %v3482_v52 = vld [vmem:[#allocation7 + $0x1f8] ss:$12 sps:$4 sm:$0xff]  }
  0xce   : > { %3118 = vmatprep.subr.bf16.mxu1 %v3454_v59  ;;  %v3489_v56 = vld [vmem:[#allocation7 + $0x218] ss:$12 sps:$4 sm:$0xff]   ;;  %v3493_v59 = vld [vmem:[#allocation7 + $0x230] ss:$12 sps:$4 sm:$0xff]  }
  0xd0   : > { %1191 = vmatpush1.bf16.msra.mxu0 %v3450_v57  ;;  %v3492_v57 = vld [vmem:[#allocation7 + $0x22c] ss:$12 sps:$4 sm:$0xff]  }
  0xd1   : > { %1192 = vmatprep.subr.bf16.mxu0 %v3452_v58  ;;  %3119 = vmatpush3.bf16.msra.mxu1 %v3456_v61  ;;  %v3490_v58 = vld [vmem:[#allocation7 + $0x228] ss:$12 sps:$4 sm:$0xff]   ;;  %v3494_v61 = vld [vmem:[#allocation8] ss:$12 sps:$4 sm:$0xff]  }
  0xd2   : > { %3120 = vmatprep.subr.bf16.mxu1 %v3459_v63  ;;  %v3497_v63 = vld [vmem:[#allocation8 + $0x18] ss:$12 sps:$4 sm:$0xff]  }
  0xd4   : > { %1193 = vmatpush1.bf16.msra.mxu0 %v3455_v60  ;;  %v3496_v60 = vld [vmem:[#allocation8 + $0x4] ss:$12 sps:$4 sm:$0xff]  }
  0xd5   : > { %1194 = vmatprep.subr.bf16.mxu0 %v3457_v62  ;;  %3121 = vmatpush3.bf16.msra.mxu1 %v3461_v2  ;;  %v3499_v62 = vld [vmem:[#allocation8 + $0x1c] ss:$12 sps:$4 sm:$0xff]  }
  0xd6   : > { %3211 = vmatprep.subr.bf16.mxu1 %v3890_v19  ;;  %v3500_v2 = vld [vmem:[#allocation8 + $0x30] ss:$12 sps:$4 sm:$0xff]  }
  0xd8   : > { %1195 = vmatpush1.bf16.msra.mxu0 %v3460_v0  ;;  %v3502_v0 = vld [vmem:[#allocation8 + $0x34] ss:$12 sps:$4 sm:$0xff]  }
  0xd9   : > { %1207 = vmatprep.subr.bf16.mxu0 %v3464_v3  ;;  %v3505_v3 = vld [vmem:[#allocation8 + $0x4c] ss:$12 sps:$4 sm:$0xff]  }
 0x17b   : > { %v608_v11 = vpop.f32.mrb[0].mxu1 }
 0x17c   : > { %v609_v12 = vadd.f32 %v608_v11, %v494_v9  ;;  %v610_v13 = vpop.f32.mrb[1].mxu1  ;;  %v3514_v11 = vld [vmem:[#allocation8 + $0x94] ss:$12 sps:$4 sm:$0xff]  }
 0x17d   : > { %v611_v14 = vadd.f32 %v610_v13, %v498_v10  ;;  %v612_v15 = vpop.f32.mrb[2].mxu1  ;;  %v3515_v13 = vld [vmem:[#allocation8 + $0xa8] ss:$12 sps:$4 sm:$0xff]  }
 0x17e   : > { %v613_v16 = vadd.f32 %v612_v15, %v494_v9  ;;  %v614_v17 = vpop.f32.mrb[3].mxu1  ;;  %v658_v20 = vmax.f32 %v609_v12, 0.0  ;;  %v3511_v9 = vld [vmem:[#allocation8 + $0x7c] ss:$12 sps:$4 sm:$0xff]   ;;  %v3520_v15 = vld [vmem:[#allocation8 + $0xc4] ss:$12 sps:$4 sm:$0xff]  }
 0x17f   : > { %v615_v18 = vadd.f32 %v614_v17, %v498_v10  ;;  %v659_v22 = vmax.f32 %v611_v14, 0.0  ;;  %v3509_v10 = vld [vmem:[#allocation8 + $0x78] ss:$12 sps:$4 sm:$0xff]   ;;  %v3512_v12 = vld [vmem:[#allocation8 + $0x90] ss:$12 sps:$4 sm:$0xff]  }
 0x180   : > { %v661_v21 = vmax.f32 %v613_v16, 0.0  ;;  %v3517_v14 = vld [vmem:[#allocation8 + $0xac] ss:$12 sps:$4 sm:$0xff]   ;;  %v3521_v16 = vld [vmem:[#allocation8 + $0xc8] ss:$12 sps:$4 sm:$0xff]  }
 0x181   : > { %v662_v23 = vmax.f32 %v615_v18, 0.0  ;;  %v3522_v17 = vld [vmem:[#allocation8 + $0x8] ss:$12 sps:$4 sm:$0xff]   ;;  %v3526_v18 = vld [vmem:[#allocation8 + $0xe0] ss:$12 sps:$4 sm:$0xff]  }
 0x182   : > { %v664_v24 = vpack.c.bf16 %v661_v21, %v658_v20  ;;  %v3518_v20 = vld [vmem:[#allocation8 + $0xc0] ss:$12 sps:$4 sm:$0xff]   ;;  %v3525_v21 = vld [vmem:[#allocation8 + $0xdc] ss:$12 sps:$4 sm:$0xff]  }
 0x183   : > { %v665_v25 = vpack.c.bf16 %v662_v23, %v659_v22  ;;  %v3527_v22 = vld [vmem:[#allocation8 + $0x20] ss:$12 sps:$4 sm:$0xff]   ;;  %v3531_v23 = vld [vmem:[#allocation8 + $0xf8] ss:$12 sps:$4 sm:$0xff]  }
 0x185   : > { %1196 = vmatprep.mubr.bf16.mxu0 %v665_v25  ;;  %1282 = vmatprep.mubr.bf16.mxu1 %v665_v25  ;;  %v3530_v25 = vld [vmem:[#allocation8 + $0xf4] ss:$12 sps:$4 sm:$0xff]  }
 0x186   : > { %1197 = vmatmul.mubr.bf16.vlgmr.msra.gmra.mrb[0].mxu0 %v664_v24  ;;  %1283 = vmatmul.mubr.bf16.vlgmr.msra.gmra.mrb[8].mxu1 %v664_v24  ;;  %v3523_v24 = vld [vmem:[#allocation8 + $0xd8] ss:$12 sps:$4 sm:$0xff]  }
 0x187   : > { %1208 = vmatpush1.bf16.msra.mxu0 %v3462_v26  ;;  %3212 = vmatpush3.bf16.msra.mxu1 %v3465_v27  ;;  %v3532_v26 = vld [vmem:[#allocation8 + $0x38] ss:$12 sps:$4 sm:$0xff]   ;;  %v3536_v27 = vld [vmem:[#allocation8 + $0x110] ss:$12 sps:$4 sm:$0xff]  }
 0x188   : > { %1209 = vmatprep.subr.bf16.mxu0 %v3468_v28  ;;  %3213 = vmatprep.subr.bf16.mxu1 %v3890_v19  ;;  %v3528_v28 = vld [vmem:[#allocation8 + $0xf0] ss:$12 sps:$4 sm:$0xff]  }
 0x189   : > { %1239 = vmatprep.mubr.bf16.mxu0 %v3889_v1  ;;  %3227 = vmatprep.mubr.msk.bf16.mxu1 %vm3891_vm1, %v3890_v19 }
 0x18b   : > { %1210 = vmatpush1.bf16.msra.mxu0 %v3466_v30  ;;  %3214 = vmatpush3.bf16.msra.mxu1 %v3469_v31  ;;  %v651_v36 = vpop.f32.mrb[4].mxu1  ;;  %v3535_v30 = vld [vmem:[#allocation8 + $0x10c] ss:$12 sps:$4 sm:$0xff]   ;;  %v3537_v31 = vld [vmem:[#allocation8 + $0x50] ss:$12 sps:$4 sm:$0xff]  }
 0x18c   : > { %1211 = vmatprep.subr.bf16.mxu0 %v3472_v32  ;;  %3215 = vmatprep.subr.bf16.mxu1 %v3890_v19  ;;  %v652_v38 = vadd.f32 %v651_v36, %v502_v33  ;;  %v3209_v39 = vpop.f32.mrb[5].mxu1  ;;  %v3541_v32 = vld [vmem:[#allocation8 + $0x128] ss:$12 sps:$4 sm:$0xff]   ;;  %v3546_v36 = vld [vmem:[#allocation8 + $0x140] ss:$12 sps:$4 sm:$0xff]  }
 0x18d   : > { %v654_v40 = vpop.f32.mrb[6].mxu1  ;;  %v3547_v39 = vld [vmem:[#allocation8 + $0x80] ss:$12 sps:$4 sm:$0xff]  }
 0x18e   : > { %v660_v41 = vmax.f32 %v652_v38, 0.0  ;;  %v655_v42 = vadd.f32 %v654_v40, %v502_v33  ;;  %v3210_v43 = vpop.f32.mrb[7].mxu1  ;;  %v3533_v33 = vld [vmem:[#allocation8 + $0x108] ss:$12 sps:$4 sm:$0xff]   ;;  %v3543_v40 = vld [vmem:[#allocation8 + $0x138] ss:$12 sps:$4 sm:$0xff]  }
 0x18f   : > { %1212 = vmatpush1.bf16.msra.mxu0 %v3470_v34  ;;  %3216 = vmatpush3.bf16.msra.mxu1 %v3473_v35  ;;  %v3540_v34 = vld [vmem:[#allocation8 + $0x124] ss:$12 sps:$4 sm:$0xff]   ;;  %v3542_v35 = vld [vmem:[#allocation8 + $0x68] ss:$12 sps:$4 sm:$0xff]  }
 0x190   : > { %1213 = vmatprep.subr.bf16.mxu0 %v3476_v37  ;;  %3217 = vmatprep.subr.bf16.mxu1 %v3890_v19  ;;  %v663_v47 = vmax.f32 %v655_v42, 0.0  ;;  %v3538_v37 = vld [vmem:[#allocation8 + $0x120] ss:$12 sps:$4 sm:$0xff]   ;;  %v3545_v38 = vld [vmem:[#allocation8 + $0x13c] ss:$12 sps:$4 sm:$0xff]  }
 0x191   : > { %v3551_v42 = vld [vmem:[#allocation8 + $0x158] ss:$12 sps:$4 sm:$0xff]   ;;  %v3548_v43 = vld [vmem:[#allocation8 + $0x150] ss:$12 sps:$4 sm:$0xff]  }
 0x192   : > { %v666_v48 = vpack.c.bf16 %v663_v47, %v660_v41  ;;  %v3550_v41 = vld [vmem:[#allocation8 + $0x154] ss:$12 sps:$4 sm:$0xff]  }
 0x193   : > { %1214 = vmatpush1.bf16.msra.mxu0 %v3474_v44  ;;  %3218 = vmatpush3.bf16.msra.mxu1 %v3477_v45  ;;  %v3552_v44 = vld [vmem:[#allocation8 + $0x98] ss:$12 sps:$4 sm:$0xff]   ;;  %v3553_v47 = vld [vmem:[#allocation8 + $0x168] ss:$12 sps:$4 sm:$0xff]  }
 0x194   : > { %1215 = vmatprep.subr.bf16.mxu0 %v3480_v46  ;;  %3219 = vmatprep.subr.bf16.mxu1 %v3890_v19  ;;  %v3555_v45 = vld [vmem:[#allocation8 + $0x16c] ss:$12 sps:$4 sm:$0xff]   ;;  %v3556_v46 = vld [vmem:[#allocation8 + $0x170] ss:$12 sps:$4 sm:$0xff]  }
 0x197   : > { %1216 = vmatpush1.bf16.msra.mxu0 %v3478_v49  ;;  %3220 = vmatpush3.bf16.msra.mxu1 %v3481_v50  ;;  %v3560_v49 = vld [vmem:[#allocation8 + $0x184] ss:$12 sps:$4 sm:$0xff]  }
 0x198   : > { %1217 = vmatprep.subr.bf16.mxu0 %v3484_v51  ;;  %3221 = vmatprep.subr.bf16.mxu1 %v3890_v19 }
 0x19b   : > { %1218 = vmatpush1.bf16.msra.mxu0 %v3482_v52  ;;  %3222 = vmatpush3.bf16.msra.mxu1 %v3485_v53 }
 0x19c   : > { %1219 = vmatprep.subr.bf16.mxu0 %v3488_v54  ;;  %3223 = vmatprep.subr.bf16.mxu1 %v3890_v19 }
 0x19f   : > { %1220 = vmatpush1.bf16.msra.mxu0 %v3486_v55  ;;  %3224 = vmatpush3.bf16.msra.mxu1 %v3489_v56  ;;  %v763_v56 = vld [vmem:[%s4281_s4] sm:$0x7] }
 0x1a0   : > { %1221 = vmatprep.subr.bf16.mxu0 %v3492_v57  ;;  %3225 = vmatprep.subr.bf16.mxu1 %v3890_v19  ;;  %v776_v57 = vrot.slane %v763_v56, %v4196_v29 }
 0x1a3   : > { %1222 = vmatpush1.bf16.msra.mxu0 %v3490_v58  ;;  %3226 = vmatpush3.bf16.msra.mxu1 %v3493_v59  ;;  %v768_v58 = vrot.slane %v763_v56, %v4187_v6  ;;  %v772_v59 = vrot.slane %v763_v56, %v4192_v8  ;;  %v3599_v56 = vld [vmem:[#allocation10 + $0x48] ss:$12 sps:$4 sm:$0xff]  }
 0x1a4   : > { %1838 = vmatprep.subr.bf16.mxu1 %v3496_v60  ;;  %3137 = vmatprep.subr.bf16.mxu0 %v3521_v16 }
 0x1a6   : > { %1240 = vmatmul.mubr.bf16.vlgmr.msra.gmra.mrb[0].mxu0 %v666_v48  ;;  %3228 = vmatmul.mubr.bf16.vlgmr.msra.gmra.mrb[12].mxu1 %v666_v48  ;;  %v3557_v48 = vld [vmem:[#allocation8 + $0xb0] ss:$12 sps:$4 sm:$0xff]  }
 0x1a7   : > { %1839 = vmatpush1.bf16.msra.mxu1 %v3494_v61  ;;  %3138 = vmatpush3.bf16.msra.mxu0 %v3522_v17 }
 0x1a8   : > { %1840 = vmatprep.subr.bf16.mxu1 %v3499_v62  ;;  %3139 = vmatprep.subr.bf16.mxu0 %v3526_v18 }
 0x1ab   : > { %1841 = vmatpush1.bf16.msra.mxu1 %v3497_v63  ;;  %3140 = vmatpush3.bf16.msra.mxu0 %v3527_v22 }
 0x1ac   : > { %1842 = vmatprep.subr.bf16.mxu1 %v3502_v0  ;;  %3141 = vmatprep.subr.bf16.mxu0 %v3531_v23 }
 0x1af   : > { %1843 = vmatpush1.bf16.msra.mxu1 %v3500_v2  ;;  %3142 = vmatpush3.bf16.msra.mxu0 %v3532_v26  ;;  %v3561_v26 = vld [vmem:[#allocation8 + $0x188] ss:$12 sps:$4 sm:$0xff]  }
 0x1b0   : > { %1844 = vmatprep.subr.bf16.mxu1 %v3505_v3  ;;  %3143 = vmatprep.subr.bf16.mxu0 %v3536_v27  ;;  %v3564_v27 = vld [vmem:[#allocation8 + $0x19c] ss:$12 sps:$4 sm:$0xff]  }
 0x1b3   : > { %1845 = vmatpush1.bf16.msra.mxu1 %v3503_v4  ;;  %3144 = vmatpush3.bf16.msra.mxu0 %v3537_v31  ;;  %v3568_v31 = vld [vmem:[#allocation8 + $0x1b4] ss:$12 sps:$4 sm:$0xff]  }
 0x1b4   : > { %1846 = vmatprep.subr.bf16.mxu1 %v3508_v5  ;;  %3145 = vmatprep.subr.bf16.mxu0 %v3541_v32  ;;  %v3566_v32 = vld [vmem:[#allocation8 + $0x1b0] ss:$12 sps:$4 sm:$0xff]  }
 0x1b7   : > { %1847 = vmatpush1.bf16.msra.mxu1 %v3506_v7  ;;  %3146 = vmatpush3.bf16.msra.mxu0 %v3542_v35  ;;  %v3570_v35 = vld [vmem:[#allocation8 + $0x1c8] ss:$12 sps:$4 sm:$0xff]  }
 0x1b8   : > { %1848 = vmatprep.subr.bf16.mxu1 %v3511_v9  ;;  %3147 = vmatprep.subr.bf16.mxu0 %v3546_v36  ;;  %v3573_v36 = vld [vmem:[#allocation8 + $0x1d0] ss:$12 sps:$4 sm:$0xff]  }
 0x1bb   : > { %1849 = vmatpush1.bf16.msra.mxu1 %v3509_v10  ;;  %3148 = vmatpush3.bf16.msra.mxu0 %v3547_v39  ;;  %v3577_v39 = vld [vmem:[#allocation8 + $0x1e8] ss:$12 sps:$4 sm:$0xff]  }
 0x1bc   : > { %1850 = vmatprep.subr.bf16.mxu1 %v3514_v11  ;;  %3149 = vmatprep.subr.bf16.mxu0 %v3551_v42  ;;  %v3581_v42 = vld [vmem:[#allocation8 + $0x200] ss:$12 sps:$4 sm:$0xff]  }
 0x1bf   : > { %1851 = vmatpush1.bf16.msra.mxu1 %v3512_v12  ;;  %3150 = vmatpush3.bf16.msra.mxu0 %v3552_v44  ;;  %v3582_v44 = vld [vmem:[#allocation8 + $0x210] ss:$12 sps:$4 sm:$0xff]  }
 0x1c0   : > { %1852 = vmatprep.subr.bf16.mxu1 %v3517_v14  ;;  %3151 = vmatprep.subr.bf16.mxu0 %v3556_v46  ;;  %v3588_v46 = vld [vmem:[#allocation8 + $0x22c] ss:$12 sps:$4 sm:$0xff]  }
 0x1c3   : > { %1853 = vmatpush1.bf16.msra.mxu1 %v3515_v13  ;;  %3152 = vmatpush3.bf16.msra.mxu0 %v3557_v48  ;;  %v3589_v48 = vld [vmem:[#allocation8 + $0x230] ss:$12 sps:$4 sm:$0xff]  }
 0x1c4   : > { %1854 = vmatprep.subr.bf16.mxu1 %v3520_v15  ;;  %3231 = vmatprep.subr.bf16.mxu0 %v3890_v19 }
 0x1c7   : > { %1855 = vmatpush1.bf16.msra.mxu1 %v3518_v20 }
 0x1c8   : > { %1856 = vmatprep.subr.bf16.mxu1 %v3525_v21 }
 0x1cb   : > { %1857 = vmatpush1.bf16.msra.mxu1 %v3523_v24 }
 0x1cc   : > { %1858 = vmatprep.subr.bf16.mxu1 %v3530_v25  ;;  %v3558_v25 = vld [vmem:[#allocation8 + $0x180] ss:$12 sps:$4 sm:$0xff]  }
 0x1cf   : > { %1859 = vmatpush1.bf16.msra.mxu1 %v3528_v28  ;;  %v3562_v28 = vld [vmem:[#allocation8 + $0x198] ss:$12 sps:$4 sm:$0xff]  }
 0x1d0   : > { %1860 = vmatprep.subr.bf16.mxu1 %v3535_v30  ;;  %v3565_v30 = vld [vmem:[#allocation8 + $0x1a0] ss:$12 sps:$4 sm:$0xff]  }
 0x1d3   : > { %1861 = vmatpush1.bf16.msra.mxu1 %v3533_v33  ;;  %v3569_v33 = vld [vmem:[#allocation8 + $0x1b8] ss:$12 sps:$4 sm:$0xff]  }
 0x1d4   : > { %1862 = vmatprep.subr.bf16.mxu1 %v3540_v34  ;;  %v3572_v34 = vld [vmem:[#allocation8 + $0x1cc] ss:$12 sps:$4 sm:$0xff]  }
 0x1d7   : > { %1863 = vmatpush1.bf16.msra.mxu1 %v3538_v37  ;;  %v3576_v37 = vld [vmem:[#allocation8 + $0x1e4] ss:$12 sps:$4 sm:$0xff]  }
 0x1d8   : > { %1864 = vmatprep.subr.bf16.mxu1 %v3545_v38  ;;  %v3574_v38 = vld [vmem:[#allocation8 + $0x1e0] ss:$12 sps:$4 sm:$0xff]  }
 0x1db   : > { %1865 = vmatpush1.bf16.msra.mxu1 %v3543_v40  ;;  %v3580_v40 = vld [vmem:[#allocation8 + $0x1fc] ss:$12 sps:$4 sm:$0xff]  }
 0x1dc   : > { %1866 = vmatprep.subr.bf16.mxu1 %v3550_v41  ;;  %v3578_v41 = vld [vmem:[#allocation8 + $0x1f8] ss:$12 sps:$4 sm:$0xff]  }
 0x1df   : > { %1867 = vmatpush1.bf16.msra.mxu1 %v3548_v43  ;;  %v3584_v43 = vld [vmem:[#allocation8 + $0x214] ss:$12 sps:$4 sm:$0xff]  }
 0x1e0   : > { %1868 = vmatprep.subr.bf16.mxu1 %v3555_v45  ;;  %v3585_v45 = vld [vmem:[#allocation8 + $0x218] ss:$12 sps:$4 sm:$0xff]  }
 0x1e3   : > { %1869 = vmatpush1.bf16.msra.mxu1 %v3553_v47  ;;  %v3586_v47 = vld [vmem:[#allocation8 + $0x228] ss:$12 sps:$4 sm:$0xff]  }
 0x1e4   : > { %1881 = vmatprep.subr.bf16.mxu1 %v3560_v49  ;;  %v3592_v49 = vld [vmem:[#allocation10 + $0x4] ss:$12 sps:$4 sm:$0xff]  }
 0x259   : > { %v3122_v50 = vpop.f32.mrb[8].mxu1 }
 0x25a   : > { %v3123_v51 = vpop.f32.mrb[9].mxu1 }
 0x25b   : > { %v3124_v52 = vadd.f32 %v3123_v51, %v3122_v50  ;;  %v3125_v53 = vpop.f32.mrb[10].mxu1  ;;  %v3590_v50 = vld [vmem:[#allocation10] ss:$12 sps:$4 sm:$0xff]   ;;  %v3595_v51 = vld [vmem:[#allocation10 + $0x1c] ss:$12 sps:$4 sm:$0xff]  }
 0x25c   : > { %v3126_v54 = vpop.f32.mrb[11].mxu1 }
 0x25d   : > { %v3127_v55 = vadd.f32 %v3126_v54, %v3125_v53  ;;  %v1285_v60 = vadd.f32 %v3124_v52, %v776_v57  ;;  %v3593_v52 = vld [vmem:[#allocation10 + $0x18] ss:$12 sps:$4 sm:$0xff]   ;;  %v3598_v53 = vld [vmem:[#allocation10 + $0x34] ss:$12 sps:$4 sm:$0xff]   ;;  %v3596_v54 = vld [vmem:[#allocation10 + $0x30] ss:$12 sps:$4 sm:$0xff]  }
 0x25f   : > { %v1288_v4 = vadd.f32 %v3127_v55, %v776_v57  ;;  %v3601_v55 = vld [vmem:[#allocation10 + $0x4c] ss:$12 sps:$4 sm:$0xff]   ;;  %v3604_v57 = vld [vmem:[#allocation10 + $0x64] ss:$12 sps:$4 sm:$0xff]  }
 0x279   : > { %v1241_v61 = vpop.f32.mrb[0].mxu0  ;;  %v1325_v62 = vpop.f32.mrb[12].mxu1 }
 0x27a   : > { %v3271_v63 = vadd.f32 %v1241_v61, %v768_v58  ;;  %v1326_v0 = vadd.f32 %v1325_v62, %v1285_v60  ;;  %v1243_v2 = vpop.f32.mrb[1].mxu0  ;;  %v3229_v3 = vpop.f32.mrb[13].mxu1  ;;  %v3605_v60 = vld [vmem:[#allocation10 + $0x78] ss:$12 sps:$4 sm:$0xff]   ;;  %v3610_v61 = vld [vmem:[#allocation10 + $0x94] ss:$12 sps:$4 sm:$0xff]  }
 0x27b   : > { %v3272_v5 = vadd.f32 %v1243_v2, %v772_v59  ;;  %v1245_v7 = vpop.f32.mrb[2].mxu0  ;;  %v1328_v9 = vpop.f32.mrb[14].mxu1  ;;  %v3608_v62 = vld [vmem:[#allocation10 + $0x90] ss:$12 sps:$4 sm:$0xff]   ;;  %v3617_v3 = vld [vmem:[#allocation10 + $0xc8] ss:$12 sps:$4 sm:$0xff]  }
 0x27c   : > { %v3273_v10 = vadd.f32 %v1245_v7, %v768_v58  ;;  %v1329_v11 = vadd.f32 %v1328_v9, %v1288_v4  ;;  %v1247_v12 = vpop.f32.mrb[3].mxu0  ;;  %v3230_v13 = vpop.f32.mrb[15].mxu1  ;;  %v1332_v15 = vmax.f32 %v3271_v63, 0.0  ;;  %v1334_v16 = vmax.f32 %v1326_v0, 0.0  ;;  %v3602_v58 = vld [vmem:[#allocation10 + $0x60] ss:$12 sps:$4 sm:$0xff]  }
 0x27d   : > { %v3274_v14 = vadd.f32 %v1247_v12, %v772_v59  ;;  %v1333_v20 = vmax.f32 %v3272_v5, 0.0  ;;  %v3607_v59 = vld [vmem:[#allocation10 + $0x7c] ss:$12 sps:$4 sm:$0xff]   ;;  %v3613_v0 = vld [vmem:[#allocation10 + $0xac] ss:$12 sps:$4 sm:$0xff]  }
 0x27e   : > { %v1335_v17 = vmax.f32 %v3273_v10, 0.0  ;;  %v1337_v18 = vmax.f32 %v1329_v11, 0.0  ;;  %v3611_v63 = vld [vmem:[#allocation10 + $0xa8] ss:$12 sps:$4 sm:$0xff]   ;;  %v3616_v2 = vld [vmem:[#allocation10 + $0xc4] ss:$12 sps:$4 sm:$0xff]  }
 0x27f   : > { %v1336_v21 = vmax.f32 %v3274_v14, 0.0  ;;  %v3618_v4 = vld [vmem:[#allocation10 + $0x8] ss:$12 sps:$4 sm:$0xff]   ;;  %v3622_v5 = vld [vmem:[#allocation10 + $0xe0] ss:$12 sps:$4 sm:$0xff]  }
 0x280   : > { %v1338_v22 = vpack.c.bf16 %v1335_v17, %v1332_v15  ;;  %v4216_v23 = vpack.c.bf16 %v1337_v18, %v1334_v16  ;;  %v3614_v7 = vld [vmem:[#allocation10 + $0xc0] ss:$12 sps:$4 sm:$0xff]   ;;  %v3621_v9 = vld [vmem:[#allocation10 + $0xdc] ss:$12 sps:$4 sm:$0xff]   ;;  %v3627_v11 = vld [vmem:[#allocation10 + $0xf8] ss:$12 sps:$4 sm:$0xff]  }
 0x281   : > { %v1339_v24 = vpack.c.bf16 %v1336_v21, %v1333_v20  ;;  %v3623_v10 = vld [vmem:[#allocation10 + $0x20] ss:$12 sps:$4 sm:$0xff]   ;;  %v3619_v12 = vld [vmem:[#allocation10 + $0xd8] ss:$12 sps:$4 sm:$0xff]   ;;  %v3632_v15 = vld [vmem:[#allocation10 + $0x110] ss:$12 sps:$4 sm:$0xff]  }
 0x282   : > { %v3626_v13 = vld [vmem:[#allocation10 + $0xf4] ss:$12 sps:$4 sm:$0xff]   ;;  %v3628_v14 = vld [vmem:[#allocation10 + $0x38] ss:$12 sps:$4 sm:$0xff]   ;;  %v3624_v16 = vld [vmem:[#allocation10 + $0xf0] ss:$12 sps:$4 sm:$0xff]  }
 0x283   : > { %1870 = vmatprep.mubr.bf16.mxu1 %v1339_v24  ;;  %1956 = vmatprep.mubr.bf16.mxu0 %v1339_v24  ;;  %v3631_v17 = vld [vmem:[#allocation10 + $0x10c] ss:$12 sps:$4 sm:$0xff]   ;;  %v3633_v18 = vld [vmem:[#allocation10 + $0x50] ss:$12 sps:$4 sm:$0xff]   ;;  %v3637_v20 = vld [vmem:[#allocation10 + $0x128] ss:$12 sps:$4 sm:$0xff]  }
 0x284   : > { %1871 = vmatmul.mubr.bf16.vlgmr.msra.gmra.mrb[16].mxu1 %v1338_v22  ;;  %1957 = vmatmul.mubr.bf16.vlgmr.msra.gmra.mrb[4].mxu0 %v1338_v22  ;;  %v3629_v21 = vld [vmem:[#allocation10 + $0x108] ss:$12 sps:$4 sm:$0xff]   ;;  %v3636_v22 = vld [vmem:[#allocation10 + $0x124] ss:$12 sps:$4 sm:$0xff]   ;;  %v3642_v24 = vld [vmem:[#allocation10 + $0x140] ss:$12 sps:$4 sm:$0xff]  }
 0x285   : > { %1882 = vmatpush1.bf16.msra.mxu1 %v3558_v25  ;;  %3232 = vmatpush3.bf16.msra.mxu0 %v3561_v26  ;;  %v3634_v25 = vld [vmem:[#allocation10 + $0x120] ss:$12 sps:$4 sm:$0xff]   ;;  %v3641_v26 = vld [vmem:[#allocation10 + $0x13c] ss:$12 sps:$4 sm:$0xff]  }
 0x286   : > { %1883 = vmatprep.subr.bf16.mxu1 %v3564_v27  ;;  %3233 = vmatprep.subr.bf16.mxu0 %v3890_v19  ;;  %v3643_v27 = vld [vmem:[#allocation10 + $0x80] ss:$12 sps:$4 sm:$0xff]  }
 0x287   : > { %1913 = vmatprep.mubr.bf16.mxu1 %v3889_v1  ;;  %3247 = vmatprep.mubr.msk.bf16.mxu0 %vm3891_vm1, %v3890_v19 }
 0x289   : > { %1884 = vmatpush1.bf16.msra.mxu1 %v3562_v28  ;;  %3234 = vmatpush3.bf16.msra.mxu0 %v3565_v30  ;;  %v3639_v28 = vld [vmem:[#allocation10 + $0x138] ss:$12 sps:$4 sm:$0xff]   ;;  %v3646_v30 = vld [vmem:[#allocation10 + $0x154] ss:$12 sps:$4 sm:$0xff]  }
 0x28a   : > { %1885 = vmatprep.subr.bf16.mxu1 %v3568_v31  ;;  %3235 = vmatprep.subr.bf16.mxu0 %v3890_v19  ;;  %v3647_v31 = vld [vmem:[#allocation10 + $0x158] ss:$12 sps:$4 sm:$0xff]  }
 0x28d   : > { %1886 = vmatpush1.bf16.msra.mxu1 %v3566_v32  ;;  %3236 = vmatpush3.bf16.msra.mxu0 %v3569_v33  ;;  %v3644_v32 = vld [vmem:[#allocation10 + $0x150] ss:$12 sps:$4 sm:$0xff]   ;;  %v3648_v33 = vld [vmem:[#allocation10 + $0x98] ss:$12 sps:$4 sm:$0xff]  }
 0x28e   : > { %1887 = vmatprep.subr.bf16.mxu1 %v3572_v34  ;;  %3237 = vmatprep.subr.bf16.mxu0 %v3890_v19  ;;  %v3651_v34 = vld [vmem:[#allocation10 + $0x16c] ss:$12 sps:$4 sm:$0xff]  }
 0x291   : > { %1888 = vmatpush1.bf16.msra.mxu1 %v3570_v35  ;;  %3238 = vmatpush3.bf16.msra.mxu0 %v3573_v36  ;;  %v3652_v35 = vld [vmem:[#allocation10 + $0x170] ss:$12 sps:$4 sm:$0xff]   ;;  %v3649_v36 = vld [vmem:[#allocation10 + $0x168] ss:$12 sps:$4 sm:$0xff]  }
 0x292   : > { %1889 = vmatprep.subr.bf16.mxu1 %v3576_v37  ;;  %3239 = vmatprep.subr.bf16.mxu0 %v3890_v19  ;;  %v3653_v37 = vld [vmem:[#allocation10 + $0xb0] ss:$12 sps:$4 sm:$0xff]  }
 0x295   : > { %1890 = vmatpush1.bf16.msra.mxu1 %v3574_v38  ;;  %3240 = vmatpush3.bf16.msra.mxu0 %v3577_v39  ;;  %v3656_v38 = vld [vmem:[#allocation10 + $0x184] ss:$12 sps:$4 sm:$0xff]  }
 0x296   : > { %1891 = vmatprep.subr.bf16.mxu1 %v3580_v40  ;;  %3241 = vmatprep.subr.bf16.mxu0 %v3890_v19 }
 0x299   : > { %1892 = vmatpush1.bf16.msra.mxu1 %v3578_v41  ;;  %3242 = vmatpush3.bf16.msra.mxu0 %v3581_v42 }
 0x29a   : > { %1893 = vmatprep.subr.bf16.mxu1 %v3584_v43  ;;  %3243 = vmatprep.subr.bf16.mxu0 %v3890_v19 }
 0x29d   : > { %1894 = vmatpush1.bf16.msra.mxu1 %v3582_v44  ;;  %3244 = vmatpush3.bf16.msra.mxu0 %v3585_v45  ;;  %v1437_v45 = vld [vmem:[%s4283_s6] sm:$0x7] }
 0x29e   : > { %1895 = vmatprep.subr.bf16.mxu1 %v3588_v46  ;;  %3245 = vmatprep.subr.bf16.mxu0 %v3890_v19  ;;  %v1450_v46 = vrot.slane %v1437_v45, %v4196_v29 }
 0x2a1   : > { %1896 = vmatpush1.bf16.msra.mxu1 %v3586_v47  ;;  %3246 = vmatpush3.bf16.msra.mxu0 %v3589_v48  ;;  %v1442_v47 = vrot.slane %v1437_v45, %v4187_v6  ;;  %v1446_v48 = vrot.slane %v1437_v45, %v4192_v8 }
 0x2a2   : > { %2512 = vmatprep.subr.bf16.mxu0 %v3592_v49  ;;  %3168 = vmatprep.subr.bf16.mxu1 %v3617_v3 }
 0x2a4   : > { %1914 = vmatmul.mubr.bf16.vlgmr.msra.gmra.mrb[16].mxu1 %v4216_v23  ;;  %3248 = vmatmul.mubr.bf16.vlgmr.msra.gmra.mrb[8].mxu0 %v4216_v23  ;;  %v3638_v23 = vld [vmem:[#allocation10 + $0x68] ss:$12 sps:$4 sm:$0xff]  }
 0x2a5   : > { %2513 = vmatpush1.bf16.msra.mxu0 %v3590_v50  ;;  %3169 = vmatpush3.bf16.msra.mxu1 %v3618_v4 }
 0x2a6   : > { %2514 = vmatprep.subr.bf16.mxu0 %v3595_v51  ;;  %3170 = vmatprep.subr.bf16.mxu1 %v3622_v5 }
 0x2a9   : > { %2515 = vmatpush1.bf16.msra.mxu0 %v3593_v52  ;;  %3171 = vmatpush3.bf16.msra.mxu1 %v3623_v10 }
 0x2aa   : > { %2516 = vmatprep.subr.bf16.mxu0 %v3598_v53  ;;  %3172 = vmatprep.subr.bf16.mxu1 %v3627_v11 }
 0x2ad   : > { %2517 = vmatpush1.bf16.msra.mxu0 %v3596_v54  ;;  %3173 = vmatpush3.bf16.msra.mxu1 %v3628_v14  ;;  %v3657_v14 = vld [vmem:[#allocation10 + $0x188] ss:$12 sps:$4 sm:$0xff]  }
 0x2ae   : > { %2518 = vmatprep.subr.bf16.mxu0 %v3601_v55  ;;  %3174 = vmatprep.subr.bf16.mxu1 %v3632_v15  ;;  %v3660_v15 = vld [vmem:[#allocation10 + $0x19c] ss:$12 sps:$4 sm:$0xff]  }
 0x2b1   : > { %2519 = vmatpush1.bf16.msra.mxu0 %v3599_v56  ;;  %3175 = vmatpush3.bf16.msra.mxu1 %v3633_v18  ;;  %v3664_v18 = vld [vmem:[#allocation10 + $0x1b4] ss:$12 sps:$4 sm:$0xff]  }
 0x2b2   : > { %2520 = vmatprep.subr.bf16.mxu0 %v3604_v57  ;;  %3176 = vmatprep.subr.bf16.mxu1 %v3637_v20  ;;  %v3662_v20 = vld [vmem:[#allocation10 + $0x1b0] ss:$12 sps:$4 sm:$0xff]  }
 0x2b5   : > { %2521 = vmatpush1.bf16.msra.mxu0 %v3602_v58  ;;  %3177 = vmatpush3.bf16.msra.mxu1 %v3638_v23  ;;  %v3666_v23 = vld [vmem:[#allocation10 + $0x1c8] ss:$12 sps:$4 sm:$0xff]  }
 0x2b6   : > { %2522 = vmatprep.subr.bf16.mxu0 %v3607_v59  ;;  %3178 = vmatprep.subr.bf16.mxu1 %v3642_v24  ;;  %v3669_v24 = vld [vmem:[#allocation10 + $0x1d0] ss:$12 sps:$4 sm:$0xff]  }
 0x2b9   : > { %2523 = vmatpush1.bf16.msra.mxu0 %v3605_v60  ;;  %3179 = vmatpush3.bf16.msra.mxu1 %v3643_v27  ;;  %v3676_v27 = vld [vmem:[#allocation10 + $0x1fc] ss:$12 sps:$4 sm:$0xff]  }
 0x2ba   : > { %2524 = vmatprep.subr.bf16.mxu0 %v3610_v61  ;;  %3180 = vmatprep.subr.bf16.mxu1 %v3647_v31  ;;  %v3680_v31 = vld [vmem:[#allocation10 + $0x214] ss:$12 sps:$4 sm:$0xff]  }
 0x2bd   : > { %2525 = vmatpush1.bf16.msra.mxu0 %v3608_v62  ;;  %3181 = vmatpush3.bf16.msra.mxu1 %v3648_v33  ;;  %v3681_v33 = vld [vmem:[#allocation10 + $0x218] ss:$12 sps:$4 sm:$0xff]  }
 0x2be   : > { %2526 = vmatprep.subr.bf16.mxu0 %v3613_v0  ;;  %3182 = vmatprep.subr.bf16.mxu1 %v3652_v35  ;;  %v3682_v35 = vld [vmem:[#allocation10 + $0x228] ss:$12 sps:$4 sm:$0xff]  }
 0x2c1   : > { %2527 = vmatpush1.bf16.msra.mxu0 %v3611_v63  ;;  %3183 = vmatpush3.bf16.msra.mxu1 %v3653_v37 }
 0x2c2   : > { %2528 = vmatprep.subr.bf16.mxu0 %v3616_v2  ;;  %3251 = vmatprep.subr.bf16.mxu1 %v3890_v19 }
 0x2c5   : > { %2529 = vmatpush1.bf16.msra.mxu0 %v3614_v7 }
 0x2c6   : > { %2530 = vmatprep.subr.bf16.mxu0 %v3621_v9 }
 0x2c9   : > { %2531 = vmatpush1.bf16.msra.mxu0 %v3619_v12 }
 0x2ca   : > { %2532 = vmatprep.subr.bf16.mxu0 %v3626_v13  ;;  %v3654_v13 = vld [vmem:[#allocation10 + $0x180] ss:$12 sps:$4 sm:$0xff]  }
 0x2cd   : > { %2533 = vmatpush1.bf16.msra.mxu0 %v3624_v16  ;;  %v3658_v16 = vld [vmem:[#allocation10 + $0x198] ss:$12 sps:$4 sm:$0xff]  }
 0x2ce   : > { %2534 = vmatprep.subr.bf16.mxu0 %v3631_v17  ;;  %v3661_v17 = vld [vmem:[#allocation10 + $0x1a0] ss:$12 sps:$4 sm:$0xff]  }
 0x2d1   : > { %2535 = vmatpush1.bf16.msra.mxu0 %v3629_v21  ;;  %v3665_v21 = vld [vmem:[#allocation10 + $0x1b8] ss:$12 sps:$4 sm:$0xff]  }
 0x2d2   : > { %2536 = vmatprep.subr.bf16.mxu0 %v3636_v22  ;;  %v3668_v22 = vld [vmem:[#allocation10 + $0x1cc] ss:$12 sps:$4 sm:$0xff]  }
 0x2d5   : > { %2537 = vmatpush1.bf16.msra.mxu0 %v3634_v25  ;;  %v3672_v25 = vld [vmem:[#allocation10 + $0x1e4] ss:$12 sps:$4 sm:$0xff]  }
 0x2d6   : > { %2538 = vmatprep.subr.bf16.mxu0 %v3641_v26  ;;  %v3673_v26 = vld [vmem:[#allocation10 + $0x1e8] ss:$12 sps:$4 sm:$0xff]  }
 0x2d9   : > { %2539 = vmatpush1.bf16.msra.mxu0 %v3639_v28  ;;  %v3674_v28 = vld [vmem:[#allocation10 + $0x1f8] ss:$12 sps:$4 sm:$0xff]  }
 0x2da   : > { %2540 = vmatprep.subr.bf16.mxu0 %v3646_v30  ;;  %v3677_v30 = vld [vmem:[#allocation10 + $0x200] ss:$12 sps:$4 sm:$0xff]  }
 0x2dd   : > { %2541 = vmatpush1.bf16.msra.mxu0 %v3644_v32  ;;  %v3678_v32 = vld [vmem:[#allocation10 + $0x210] ss:$12 sps:$4 sm:$0xff]  }
 0x2de   : > { %2542 = vmatprep.subr.bf16.mxu0 %v3651_v34  ;;  %v3684_v34 = vld [vmem:[#allocation10 + $0x22c] ss:$12 sps:$4 sm:$0xff]  }
 0x2e1   : > { %2543 = vmatpush1.bf16.msra.mxu0 %v3649_v36  ;;  %v3685_v36 = vld [vmem:[#allocation10 + $0x230] ss:$12 sps:$4 sm:$0xff]  }
 0x2e2   : > { %2555 = vmatprep.subr.bf16.mxu0 %v3656_v38 }
 0x357   : > { %v3153_v39 = vpop.f32.mrb[4].mxu0 }
 0x358   : > { %v3154_v40 = vpop.f32.mrb[5].mxu0 }
 0x359   : > { %v3155_v41 = vadd.f32 %v3154_v40, %v3153_v39  ;;  %v3156_v42 = vpop.f32.mrb[6].mxu0 }
 0x35a   : > { %v3157_v43 = vpop.f32.mrb[7].mxu0 }
 0x35b   : > { %v3158_v44 = vadd.f32 %v3157_v43, %v3156_v42  ;;  %v1959_v49 = vadd.f32 %v3155_v41, %v1450_v46  ;;  %v2111_v43 = vld [vmem:[%s4285_s8] sm:$0x7] }
 0x35c   : > { %v2116_v45 = vrot.slane %v2111_v43, %v4187_v6 }
 0x35d   : > { %v1962_v56 = vadd.f32 %v3158_v44, %v1450_v46  ;;  %v2124_v44 = vrot.slane %v2111_v43, %v4196_v29  ;;  %v2120_v46 = vrot.slane %v2111_v43, %v4192_v8 }
 0x377   : > { %v1915_v50 = vpop.f32.mrb[16].mxu1  ;;  %v1999_v51 = vpop.f32.mrb[8].mxu0 }
 0x378   : > { %v3275_v52 = vadd.f32 %v1915_v50, %v1442_v47  ;;  %v2000_v53 = vadd.f32 %v1999_v51, %v1959_v49  ;;  %v1917_v54 = vpop.f32.mrb[17].mxu1  ;;  %v3249_v55 = vpop.f32.mrb[9].mxu0 }
 0x379   : > { %v3276_v57 = vadd.f32 %v1917_v54, %v1446_v48  ;;  %v1919_v58 = vpop.f32.mrb[18].mxu1  ;;  %v2002_v59 = vpop.f32.mrb[10].mxu0 }
 0x37a   : > { %v3277_v60 = vadd.f32 %v1919_v58, %v1442_v47  ;;  %v2003_v61 = vadd.f32 %v2002_v59, %v1962_v56  ;;  %v1921_v62 = vpop.f32.mrb[19].mxu1  ;;  %v3250_v63 = vpop.f32.mrb[11].mxu0  ;;  %v2006_v2 = vmax.f32 %v3275_v52, 0.0  ;;  %v2008_v3 = vmax.f32 %v2000_v53, 0.0 }
 0x37b   : > { %v3278_v0 = vadd.f32 %v1921_v62, %v1446_v48  ;;  %v2007_v7 = vmax.f32 %v3276_v57, 0.0 }
 0x37c   : > { %v2009_v4 = vmax.f32 %v3277_v60, 0.0  ;;  %v2011_v5 = vmax.f32 %v2003_v61, 0.0 }
 0x37d   : > { %v2010_v9 = vmax.f32 %v3278_v0, 0.0 }
 0x37e   : > { %v2012_v10 = vpack.c.bf16 %v2009_v4, %v2006_v2  ;;  %v2014_v11 = vpack.c.bf16 %v2011_v5, %v2008_v3 }
 0x37f   : > { %v2013_v12 = vpack.c.bf16 %v2010_v9, %v2007_v7 }
 0x381   : > { %2544 = vmatprep.mubr.bf16.mxu0 %v2013_v12  ;;  %2630 = vmatprep.mubr.bf16.mxu1 %v2013_v12 }
 0x382   : > { %2545 = vmatmul.mubr.bf16.vlgmr.msra.gmra.mrb[12].mxu0 %v2012_v10  ;;  %2631 = vmatmul.mubr.bf16.vlgmr.msra.gmra.mrb[20].mxu1 %v2012_v10 }
 0x383   : > { %2556 = vmatpush1.bf16.msra.mxu0 %v3654_v13  ;;  %3252 = vmatpush3.bf16.msra.mxu1 %v3657_v14 }
 0x384   : > { %2557 = vmatprep.subr.bf16.mxu0 %v3660_v15  ;;  %3253 = vmatprep.subr.bf16.mxu1 %v3890_v19 }
 0x385   : > { %2587 = vmatprep.mubr.bf16.mxu0 %v3889_v1  ;;  %3267 = vmatprep.mubr.msk.bf16.mxu1 %vm3891_vm1, %v3890_v19  ;;  %v3670_v1 = vld [vmem:[#allocation10 + $0x1e0] ss:$12 sps:$4 sm:$0xff]  }
 0x387   : > { %2558 = vmatpush1.bf16.msra.mxu0 %v3658_v16  ;;  %3254 = vmatpush3.bf16.msra.mxu1 %v3661_v17 }
 0x388   : > { %2559 = vmatprep.subr.bf16.mxu0 %v3664_v18  ;;  %3255 = vmatprep.subr.bf16.mxu1 %v3890_v19 }
 0x38b   : > { %2560 = vmatpush1.bf16.msra.mxu0 %v3662_v20  ;;  %3256 = vmatpush3.bf16.msra.mxu1 %v3665_v21  ;;  %v3095_v20 = vld [vmem:[#allocation2] ss:$0 sm:$0xff] }
 0x38c   : > { %2561 = vmatprep.subr.bf16.mxu0 %v3668_v22  ;;  %3257 = vmatprep.subr.bf16.mxu1 %v3890_v19 }
 0x38f   : > { %2562 = vmatpush1.bf16.msra.mxu0 %v3666_v23  ;;  %3258 = vmatpush3.bf16.msra.mxu1 %v3669_v24 }
 0x390   : > { %2563 = vmatprep.subr.bf16.mxu0 %v3672_v25  ;;  %3259 = vmatprep.subr.bf16.mxu1 %v3890_v19 }
 0x393   : > { %2564 = vmatpush1.bf16.msra.mxu0 %v3670_v1  ;;  %3260 = vmatpush3.bf16.msra.mxu1 %v3673_v26 }
 0x394   : > { %2565 = vmatprep.subr.bf16.mxu0 %v3676_v27  ;;  %3261 = vmatprep.subr.bf16.mxu1 %v3890_v19 }
 0x397   : > { %2566 = vmatpush1.bf16.msra.mxu0 %v3674_v28  ;;  %3262 = vmatpush3.bf16.msra.mxu1 %v3677_v30 }
 0x398   : > { %2567 = vmatprep.subr.bf16.mxu0 %v3680_v31  ;;  %3263 = vmatprep.subr.bf16.mxu1 %v3890_v19 }
 0x39b   : > { %2568 = vmatpush1.bf16.msra.mxu0 %v3678_v32  ;;  %3264 = vmatpush3.bf16.msra.mxu1 %v3681_v33 }
 0x39c   : > { %2569 = vmatprep.subr.bf16.mxu0 %v3684_v34  ;;  %3265 = vmatprep.subr.bf16.mxu1 %v3890_v19  ;;  %v2686_v19 = vld [vmem:[%s4305_s14] sm:$0x7] }
 0x39d   : > { %v2691_v51 = vrot.slane %v2686_v19, %v4187_v6  ;;  %v2695_v57 = vrot.slane %v2686_v19, %v4192_v8  ;;  %v2699_v4 = vrot.slane %v2686_v19, %v4196_v29 }
 0x39f   : > { %2570 = vmatpush1.bf16.msra.mxu0 %v3682_v35  ;;  %3266 = vmatpush3.bf16.msra.mxu1 %v3685_v36 }
 0x3a2   : > { %2588 = vmatmul.mubr.bf16.vlgmr.msra.gmra.mrb[12].mxu0 %v2014_v11  ;;  %3268 = vmatmul.mubr.bf16.vlgmr.msra.gmra.mrb[24].mxu1 %v2014_v11 }
 0x455   : > { %v3184_v37 = vpop.f32.mrb[20].mxu1 }
 0x456   : > { %v3185_v38 = vpop.f32.mrb[21].mxu1 }
 0x457   : > { %v3186_v39 = vadd.f32 %v3185_v38, %v3184_v37  ;;  %v3187_v40 = vpop.f32.mrb[22].mxu1 }
 0x458   : > { %v3188_v41 = vpop.f32.mrb[23].mxu1 }
 0x459   : > { %v3189_v42 = vadd.f32 %v3188_v41, %v3187_v40  ;;  %v2633_v47 = vadd.f32 %v3186_v39, %v2124_v44 }
 0x45b   : > { %v2636_v55 = vadd.f32 %v3189_v42, %v2124_v44 }
 0x475   : > { %v2589_v48 = vpop.f32.mrb[12].mxu0  ;;  %v2673_v49 = vpop.f32.mrb[24].mxu1 }
 0x476   : > { %v3279_v50 = vadd.f32 %v2589_v48, %v2116_v45  ;;  %v2674_v52 = vadd.f32 %v2673_v49, %v2633_v47  ;;  %v2591_v53 = vpop.f32.mrb[13].mxu0  ;;  %v3269_v54 = vpop.f32.mrb[25].mxu1 }
 0x477   : > { %v3280_v56 = vadd.f32 %v2591_v53, %v2120_v46  ;;  %v2593_v58 = vpop.f32.mrb[14].mxu0  ;;  %v2676_v59 = vpop.f32.mrb[26].mxu1 }
 0x478   : > { %v2680_v60 = vmax.f32 %v3279_v50, 0.0  ;;  %v3281_v61 = vadd.f32 %v2593_v58, %v2116_v45  ;;  %v2677_v62 = vadd.f32 %v2676_v59, %v2636_v55  ;;  %v2595_v63 = vpop.f32.mrb[15].mxu0  ;;  %v3270_v0 = vpop.f32.mrb[27].mxu1  ;;  %v2682_v2 = vmax.f32 %v2674_v52, 0.0 }
 0x479   : > { %v2681_v3 = vmax.f32 %v3280_v56, 0.0  ;;  %v3282_v5 = vadd.f32 %v2595_v63, %v2120_v46 }
 0x47a   : > { %v2703_v6 = vmul.f32 %v2691_v51, %v2680_v60  ;;  %v2683_v7 = vmax.f32 %v3281_v61, 0.0  ;;  %v2685_v10 = vmax.f32 %v2677_v62, 0.0  ;;  %v2705_v8 = vmul.f32 %v2699_v4, %v2682_v2 }
 0x47b   : > { %v2704_v9 = vmul.f32 %v2695_v57, %v2681_v3  ;;  %v2684_v11 = vmax.f32 %v3282_v5, 0.0 }
 0x47c   : > { %v2706_v12 = vmul.f32 %v2691_v51, %v2683_v7  ;;  %v2708_v15 = vmul.f32 %v2699_v4, %v2685_v10 }
 0x47d   : > { %v2707_v13 = vmul.f32 %v2695_v57, %v2684_v11  ;;  %v2709_v14 = vadd.f32 %v2704_v9, %v2703_v6 }
 0x47f   : > { %v2710_v16 = vadd.f32 %v2709_v14, %v2705_v8  ;;  %v2713_v17 = vadd.f32 %v2707_v13, %v2706_v12 }
 0x481   : > { %2711 = vadd.xlane.f32.xlu0 %v2710_v16  ;;  %v2714_v18 = vadd.f32 %v2713_v17, %v2708_v15 }
 0x485   : > { %2715 = vadd.xlane.f32.xlu0 %v2714_v18 }
 0x50e   : > { %v2712_v21 = vpop.xlane.xlu0 %2711 }
 0x50f   : > { %v2724_v29 = vadd.f32 %v3095_v20, %v2712_v21 }
 0x511   : > { %v3096_v22 = vmul.f32 -1.442695, %v2724_v29 }
 0x512   : > { %v2716_v23 = vpop.xlane.xlu0 %2715 }
 0x513   : > { %3686 = vpow2.f32 %v3096_v22  ;;  %v2725_v24 = vadd.f32 %v3095_v20, %v2716_v23 }
 0x515   : > { %v3097_v25 = vmul.f32 -1.442695, %v2725_v24 }
 0x517   : > { %3688 = vpow2.f32 %v3097_v25 }
 0x51d   : > { %v3687_v1 = vpop.eup %3686 }
 0x51e   : > { %v2732_v26 = vadd.f32 1.0, %v3687_v1 }
 0x520   : > { %3690 = vrcp.f32 %v2732_v26 }
 0x521   : > { %v3689_v27 = vpop.eup %3688 }
 0x522   : > { %v2733_v28 = vadd.f32 1.0, %v3689_v27 }
 0x524   : > { %3692 = vrcp.f32 %v2733_v28 }
 0x52a   : > { %v3691_v30 = vpop.eup %3690 }
 0x52b   : > { %2739 = vst.msk [vmem:[%s467_s23] sm:$0xff] %vm2738_vm2, %v3691_v30 }
 0x52e   : > { %v3693_v31 = vpop.eup %3692 }
 0x52f   : > { %2740 = vst.msk [vmem:[%s467_s23 + $0x8] sm:$0xff] %vm2738_vm2, %v3693_v31 }
 0x530 PF: > { %s4308_s22 = smov %s4109_s19  ;;  %p25_p11 = scmp.ge.s32.totalorder %s4109_s19, 4  }
 0x531   : > { %s4309_s19 = smov %s3870_s20  ;;  %s4310_s20 = smov %s3874_s21 }
 0x532   : > { %s4311_s21 = smov %s4120_s17  ;;  %27 = sbr.rel (!%p25_p11) target bundleno = 8 (0x8), region = 120 }
 0x539   :  { %2763 = vsyncpa [#allocation4], 1 }
 0x53a   :  { %2765 = vsyncpa [#allocation4 + $0x1], 1 }
 0x53b   :  { %2766 = vsyncpa [#allocation6], 1 }
 0x53c   :  { %2767 = vsyncpa [#allocation9], 1 }

</bundles_post_ra>
